<compile_context>
chip_gen: v7x
topology: tpu7x:2x2x1
jax: 0.10.0
libtpu: 0.0.40
codegen_flags: <defaults>
</compile_context>

<pallas_src>
import jax
import jax.numpy as jnp
from jax.experimental import pallas as pl
from jax.experimental.pallas import tpu as pltpu


def _vmem_limit_and_tile():
    """Generation-aware scoped-VMEM limit and default point tile.

    v5e/v6e: 128 MiB physical VMEM -> 96 MiB scoped limit, tile_n=4096.
    v7x    :  64 MiB physical/TC   -> 48 MiB scoped limit, tile_n=2048.
    Unknown / query failure        -> conservative v7x numbers (safe everywhere).
    """
    try:
        cap = pltpu.get_tpu_info().vmem_capacity_bytes
    except Exception:
        cap = 64 * 1024 * 1024
    if cap >= 128 * 1024 * 1024:
        return 96 * 1024 * 1024, 4096
    return 48 * 1024 * 1024, 2048


# ----------------------------------------------------------------------------
# Kernel A: PointNetfeat trunk.
#   per (batch, point-chunk, point-tile):
#       conv1+bn1+relu (64) -> conv2+bn2+relu (128) -> conv3 (1024, bias hoisted)
#   and an online max over the point-tile axis -> per-chunk global feature
#   (1024), using the accumulator pattern (same output block across the
#   reduction grid axis).  All matmuls: bf16 operands, f32 accumulation.
# ----------------------------------------------------------------------------
def _featstage_kernel(x_ref, w1_ref, b1_ref, w2_ref, b2_ref, w3_ref, gmax_ref):
    x = x_ref[0]                                                   # (TILE_N, Cin) bf16
    h1 = jnp.maximum(
        jnp.dot(x, w1_ref[...], preferred_element_type=jnp.float32) + b1_ref[...],
        0.0)                                                       # (TILE_N, 64)
    h2 = jnp.maximum(
        jnp.dot(h1.astype(jnp.bfloat16), w2_ref[...],
                preferred_element_type=jnp.float32) + b2_ref[...],
        0.0)                                                       # (TILE_N, 128)
    h3 = jnp.dot(h2.astype(jnp.bfloat16), w3_ref[...],
                 preferred_element_type=jnp.float32)               # (TILE_N, 1024)
    # bn3 bias is hoisted to the wrapper: max(dot + b3) == max(dot) + b3.
    tile_max = jnp.max(h3, axis=0, keepdims=True)                  # (1, 1024)

    @pl.when(pl.program_id(2) == 0)
    def _():
        gmax_ref[0] = jnp.full_like(gmax_ref[0], -jnp.inf)

    gmax_ref[0] = jnp.maximum(gmax_ref[0], tile_max)


# ----------------------------------------------------------------------------
# Kernel B: dense classification head.
#   h1 = relu(x @ w1 + b1) is recomputed per tile (cheaper than a pointfeat
#   HBM round trip).  concat([global(1024), pointfeat(64)]) @ W(1088->512) is
#   expressed as  h1 @ Wp + gpart, where gpart = g @ Wg + bc1 is precomputed
#   once per batch outside the kernel (M=1 matmul hoisted off the MXU path).
#   Then 512->256->128->k_pad(=8) with folded BN + ReLU.  Output is a slim
#   (TILE_N, 8) f32 slab; wrapper slices the first k lanes.
# ----------------------------------------------------------------------------
def _densecls_kernel(x_ref, w1_ref, b1_ref, gpart_ref, wp_ref,
                     w2_ref, b2_ref, w3_ref, b3_ref, w4_ref, b4_ref, out_ref):
    x = x_ref[0]                                                   # (TILE_N, Cin) bf16
    h1 = jnp.maximum(
        jnp.dot(x, w1_ref[...], preferred_element_type=jnp.float32) + b1_ref[...],
        0.0)                                                       # (TILE_N, 64)
    h = jnp.maximum(
        jnp.dot(h1.astype(jnp.bfloat16), wp_ref[...],
                preferred_element_type=jnp.float32) + gpart_ref[0],
        0.0)                                                       # (TILE_N, 512)
    h = jnp.maximum(
        jnp.dot(h.astype(jnp.bfloat16), w2_ref[...],
                preferred_element_type=jnp.float32) + b2_ref[...],
        0.0)                                                       # (TILE_N, 256)
    h = jnp.maximum(
        jnp.dot(h.astype(jnp.bfloat16), w3_ref[...],
                preferred_element_type=jnp.float32) + b3_ref[...],
        0.0)                                                       # (TILE_N, 128)
    out_ref[0] = (jnp.dot(h.astype(jnp.bfloat16), w4_ref[...],
                          preferred_element_type=jnp.float32)
                  + b4_ref[...])                                   # (TILE_N, k_pad)


# ----------------------------------------------------------------------------
# Glue: parameter setup / BN folding / pallas_call plumbing.
# ----------------------------------------------------------------------------
def fold_bn(w, b, bn, eps=1e-5):
    """Fold eval-mode BatchNorm1d into a kernel-size-1 Conv1d.

    w: (Cout, Cin) PyTorch conv weight, b: (Cout,).
    Returns (Cin, Cout) f32 weight and (1, Cout) f32 bias for x(B,N,Cin) @ W.
    """
    gamma, beta, mean, var = bn
    scale = gamma / jnp.sqrt(var + eps)                  # (Cout,)
    w_eff = (w * scale[:, None]).T                       # (Cin, Cout)
    b_eff = ((b - mean) * scale + beta).reshape(1, -1)   # (1, Cout)
    return w_eff.astype(jnp.float32), b_eff.astype(jnp.float32)


def pointnet_dense_cls(x_ncl, params, tile_n=None):
    """Forward of PointNetDenseCls. Input x_ncl: (B, Cin, N) like PyTorch NCL.

    Returns (out, trans, trans_feat) with out: (B, N, k); trans/trans_feat are
    None (feature_transform=False, input_transform=False).
    """
    B, cin, N = x_ncl.shape
    vmem_limit, default_tile = _vmem_limit_and_tile()
    if tile_n is None:
        tile_n = default_tile
    tile_n = min(tile_n, N)
    assert N % tile_n == 0, "N must be a multiple of tile_n"
    assert tile_n % 8 == 0, "tile_n must be a multiple of 8"
    n_tiles = N // tile_n
    # Split the point reduction across 2 parallel chunks when a single batch
    # would otherwise leave a v7x TensorCore idle.
    n_chunks = 2 if (B == 1 and n_tiles % 2 == 0 and n_tiles >= 2) else 1
    tiles_per_chunk = n_tiles // n_chunks

    bf16 = jnp.bfloat16
    xb = jnp.transpose(x_ncl, (0, 2, 1)).astype(bf16)              # (B, N, Cin) bf16

    p = params
    k = p['conv4.w'].shape[0]
    k_pad = max(8, ((k + 7) // 8) * 8)

    # ---- PointNetfeat trunk params (BN folded, bf16 weights / f32 biases) ----
    w1, b1 = fold_bn(p['feat.conv1.w'], p['feat.conv1.b'], p['feat.bn1'])
    w2, b2 = fold_bn(p['feat.conv2.w'], p['feat.conv2.b'], p['feat.bn2'])
    w3, b3 = fold_bn(p['feat.conv3.w'], p['feat.conv3.b'], p['feat.bn3'])
    w1b, w2b, w3b = w1.astype(bf16), w2.astype(bf16), w3.astype(bf16)

    gmax_chunks = pl.pallas_call(
        _featstage_kernel,
        out_shape=jax.ShapeDtypeStruct((B, n_chunks, 1024), jnp.float32),
        grid=(B, n_chunks, tiles_per_chunk),
        in_specs=[
            pl.BlockSpec((1, tile_n, cin),
                         lambda b, c, n: (b, c * tiles_per_chunk + n, 0)),
            pl.BlockSpec((cin, 64), lambda b, c, n: (0, 0)),
            pl.BlockSpec((1, 64), lambda b, c, n: (0, 0)),
            pl.BlockSpec((64, 128), lambda b, c, n: (0, 0)),
            pl.BlockSpec((1, 128), lambda b, c, n: (0, 0)),
            pl.BlockSpec((128, 1024), lambda b, c, n: (0, 0)),
        ],
        out_specs=pl.BlockSpec((1, 1, 1024), lambda b, c, n: (b, c, 0)),
        compiler_params=pltpu.CompilerParams(
            dimension_semantics=("parallel", "parallel", "arbitrary"),
            vmem_limit_bytes=vmem_limit),
    )(xb, w1b, b1, w2b, b2, w3b)

    # Cross-chunk max + hoisted bn3 bias -> global feature (B, 1, 1024) f32.
    gmax = jnp.max(gmax_chunks, axis=1, keepdims=True) + b3

    # ---- Dense head params (BN folded); split the 1088->512 weight. ----
    # cat order in PointNetfeat is [global(1024), pointfeat(64)].
    wc1, bc1 = fold_bn(p['conv1.w'], p['conv1.b'], p['bn1'])       # (1088, 512)
    wg = wc1[:1024, :]                                             # (1024, 512)
    wp = wc1[1024:, :]                                             # (64, 512)
    wc2, bc2 = fold_bn(p['conv2.w'], p['conv2.b'], p['bn2'])       # (512, 256)
    wc3, bc3 = fold_bn(p['conv3.w'], p['conv3.b'], p['bn3'])       # (256, 128)
    # Zero-pad conv4 to k_pad (=8) output lanes: slim output slab.
    wc4 = p['conv4.w'].T.astype(jnp.float32)                       # (128, k)
    bc4 = p['conv4.b'].reshape(1, -1).astype(jnp.float32)          # (1, k)
    wc4p = jnp.zeros((128, k_pad), jnp.float32).at[:, :k].set(wc4)
    bc4p = jnp.zeros((1, k_pad), jnp.float32).at[:, :k].set(bc4)

    # Hoisted per-batch global-feature projection (tiny M=1 matmul, done once).
    gpart = jnp.einsum('boc,cd->bod', gmax, wg) + bc1              # (B, 1, 512) f32

    wpb, wc2b, wc3b, wc4b = (wp.astype(bf16), wc2.astype(bf16),
                             wc3.astype(bf16), wc4p.astype(bf16))

    out_pad = pl.pallas_call(
        _densecls_kernel,
        out_shape=jax.ShapeDtypeStruct((B, N, k_pad), jnp.float32),
        grid=(B, n_tiles),
        in_specs=[
            pl.BlockSpec((1, tile_n, cin), lambda b, n: (b, n, 0)),
            pl.BlockSpec((cin, 64), lambda b, n: (0, 0)),
            pl.BlockSpec((1, 64), lambda b, n: (0, 0)),
            pl.BlockSpec((1, 1, 512), lambda b, n: (b, 0, 0)),
            pl.BlockSpec((64, 512), lambda b, n: (0, 0)),
            pl.BlockSpec((512, 256), lambda b, n: (0, 0)),
            pl.BlockSpec((1, 256), lambda b, n: (0, 0)),
            pl.BlockSpec((256, 128), lambda b, n: (0, 0)),
            pl.BlockSpec((1, 128), lambda b, n: (0, 0)),
            pl.BlockSpec((128, k_pad), lambda b, n: (0, 0)),
            pl.BlockSpec((1, k_pad), lambda b, n: (0, 0)),
        ],
        out_specs=pl.BlockSpec((1, tile_n, k_pad), lambda b, n: (b, n, 0)),
        compiler_params=pltpu.CompilerParams(
            dimension_semantics=("parallel", "parallel"),
            vmem_limit_bytes=vmem_limit),
    )(xb, w1b, b1, gpart, wpb, wc2b, bc2, wc3b, bc3, wc4b, bc4p)

    out = out_pad[..., :k] if k_pad != k else out_pad              # (B, N, k)
    return out, None, None


# ----------------------------------------------------------------------------
# Deterministic synthetic parameters (shapes from the module __init__).
# ----------------------------------------------------------------------------
def init_params(key, input_dim=3, k=2):
    keys = iter(jax.random.split(key, 64))

    def conv(cin, cout):
        w = 0.1 * jax.random.normal(next(keys), (cout, cin), jnp.float32)
        b = 0.01 * jax.random.normal(next(keys), (cout,), jnp.float32)
        return w, b

    def bn(c):
        gamma = 1.0 + 0.1 * jax.random.normal(next(keys), (c,), jnp.float32)
        beta = 0.1 * jax.random.normal(next(keys), (c,), jnp.float32)
        mean = 0.1 * jax.random.normal(next(keys), (c,), jnp.float32)
        var = 1.0 + 0.1 * jnp.abs(jax.random.normal(next(keys), (c,), jnp.float32))
        return (gamma, beta, mean, var)

    p = {}
    p['feat.conv1.w'], p['feat.conv1.b'] = conv(input_dim, 64)
    p['feat.conv2.w'], p['feat.conv2.b'] = conv(64, 128)
    p['feat.conv3.w'], p['feat.conv3.b'] = conv(128, 1024)
    p['feat.bn1'] = bn(64)
    p['feat.bn2'] = bn(128)
    p['feat.bn3'] = bn(1024)
    p['conv1.w'], p['conv1.b'] = conv(1088, 512)
    p['conv2.w'], p['conv2.b'] = conv(512, 256)
    p['conv3.w'], p['conv3.b'] = conv(256, 128)
    p['conv4.w'], p['conv4.b'] = conv(128, k)
    p['bn1'] = bn(512)
    p['bn2'] = bn(256)
    p['bn3'] = bn(128)
    return p


# ----------------------------------------------------------------------------
# Pure-JAX f32 reference (straight transcription of the PyTorch forward, eval BN).
# ----------------------------------------------------------------------------
def reference_forward(x_ncl, params, eps=1e-5):
    def conv1d(x, w, b):                      # x: (B,N,Cin), w: (Cout,Cin)
        return jnp.einsum('bnc,oc->bno', x, w) + b

    def bn(x, pbn):
        gamma, beta, mean, var = pbn
        return (x - mean) * (gamma / jnp.sqrt(var + eps)) + beta

    x = jnp.transpose(x_ncl, (0, 2, 1)).astype(jnp.float32)        # (B, N, Cin)
    n_pts = x.shape[1]
    h1 = jax.nn.relu(bn(conv1d(x, params['feat.conv1.w'], params['feat.conv1.b']),
                        params['feat.bn1']))
    pointfeat = h1
    h2 = jax.nn.relu(bn(conv1d(h1, params['feat.conv2.w'], params['feat.conv2.b']),
                        params['feat.bn2']))
    h3 = bn(conv1d(h2, params['feat.conv3.w'], params['feat.conv3.b']),
            params['feat.bn3'])
    g = jnp.max(h3, axis=1, keepdims=True)                         # (B,1,1024)
    gb = jnp.broadcast_to(g, (g.shape[0], n_pts, 1024))
    cat = jnp.concatenate([gb, pointfeat], axis=-1)                # (B,N,1088)
    y = jax.nn.relu(bn(conv1d(cat, params['conv1.w'], params['conv1.b']),
                       params['bn1']))
    y = jax.nn.relu(bn(conv1d(y, params['conv2.w'], params['conv2.b']),
                       params['bn2']))
    y = jax.nn.relu(bn(conv1d(y, params['conv3.w'], params['conv3.b']),
                       params['bn3']))
    y = conv1d(y, params['conv4.w'], params['conv4.b'])            # (B,N,k)
    return y


if __name__ == "__main__":
    key = jax.random.PRNGKey(0)
    kp, kx = jax.random.split(key)

    B, CIN, N, K = 2, 3, 256, 2
    params = init_params(kp, input_dim=CIN, k=K)
    x = jax.random.normal(kx, (B, CIN, N), jnp.float32)            # NCL like PyTorch

    out, trans, trans_feat = pointnet_dense_cls(x, params)         # tile_n auto
    out = jax.block_until_ready(out)

    ref = reference_forward(x, params)
    assert out.shape == (B, N, K), out.shape
    # bf16 matmuls (f32 accumulation) vs f32 reference: relative-to-scale check.
    max_err = float(jnp.max(jnp.abs(out - ref)))
    scale = max(float(jnp.max(jnp.abs(ref))), 1.0)
    if max_err > 5e-2 * scale:
        raise AssertionError(
            f"Pallas output mismatch vs reference: max abs err={max_err}, "
            f"ref scale={scale}")

    print("KERNEL_OK")
</pallas_src>

<mosaic_0001>
module attributes {stable_mosaic.version = 11 : i64} {
  func.func @_featstage_kernel(%arg0: i32, %arg1: i32, %arg2: i32, %arg3: memref<1x256x3xbf16, #tpu.memory_space<vmem>>, %arg4: memref<3x64xbf16, #tpu.memory_space<vmem>>, %arg5: memref<1x64xf32, #tpu.memory_space<vmem>>, %arg6: memref<64x128xbf16, #tpu.memory_space<vmem>>, %arg7: memref<1x128xf32, #tpu.memory_space<vmem>>, %arg8: memref<128x1024xbf16, #tpu.memory_space<vmem>>, %arg9: memref<1x1x1024xf32, #tpu.memory_space<vmem>>) attributes {dimension_semantics = [#tpu.dimension_semantics<parallel>, #tpu.dimension_semantics<parallel>, #tpu.dimension_semantics<arbitrary>], iteration_bounds = array<i64: 2, 1, 1>, scalar_prefetch = 0 : i64, scratch_operands = 0 : i64, tpu.core_type = #tpu.core_type<tc>, window_params = [{transform_indices = @transform_0, window_bounds = array<i64: 1, 256, 3>}, {pipeline_mode = #tpu.pipeline_mode<synchronous>, transform_indices = @transform_1, window_bounds = array<i64: 3, 64>}, {pipeline_mode = #tpu.pipeline_mode<synchronous>, transform_indices = @transform_2, window_bounds = array<i64: 1, 64>}, {pipeline_mode = #tpu.pipeline_mode<synchronous>, transform_indices = @transform_3, window_bounds = array<i64: 64, 128>}, {pipeline_mode = #tpu.pipeline_mode<synchronous>, transform_indices = @transform_4, window_bounds = array<i64: 1, 128>}, {pipeline_mode = #tpu.pipeline_mode<synchronous>, transform_indices = @transform_5, window_bounds = array<i64: 128, 1024>}, {transform_indices = @transform_6, window_bounds = array<i64: 1, 1, 1024>}]} {
    %c0 = arith.constant 0 : index
    %c0_0 = arith.constant 0 : index
    %c0_1 = arith.constant 0 : index
    %0 = vector.load %arg3[%c0, %c0_0, %c0_1] : memref<1x256x3xbf16, #tpu.memory_space<vmem>>, vector<1x256x3xbf16>
    %1 = vector.shape_cast %0 : vector<1x256x3xbf16> to vector<256x3xbf16>
    %c0_2 = arith.constant 0 : index
    %c0_3 = arith.constant 0 : index
    %2 = vector.load %arg4[%c0_2, %c0_3] : memref<3x64xbf16, #tpu.memory_space<vmem>>, vector<3x64xbf16>
    %cst = arith.constant dense<0.000000e+00> : vector<256x64xf32>
    %3 = tpu.matmul %1, %2, %cst {dimension_numbers = #tpu.dot_dimension_numbers<[1], [0], [0], [1], [0, 0, 1, 1], [], []>} : vector<256x3xbf16>, vector<3x64xbf16>, vector<256x64xf32> -> vector<256x64xf32>
    %c0_4 = arith.constant 0 : index
    %c0_5 = arith.constant 0 : index
    %4 = vector.load %arg5[%c0_4, %c0_5] : memref<1x64xf32, #tpu.memory_space<vmem>>, vector<1x64xf32>
    %5 = vector.broadcast %4 : vector<1x64xf32> to vector<256x64xf32>
    %6 = arith.addf %3, %5 : vector<256x64xf32>
    %cst_6 = arith.constant 0.000000e+00 : f32
    %7 = vector.broadcast %cst_6 : f32 to vector<256x64xf32>
    %8 = arith.maximumf %6, %7 : vector<256x64xf32>
    %9 = arith.truncf %8 : vector<256x64xf32> to vector<256x64xbf16>
    %c0_7 = arith.constant 0 : index
    %c0_8 = arith.constant 0 : index
    %10 = vector.load %arg6[%c0_7, %c0_8] : memref<64x128xbf16, #tpu.memory_space<vmem>>, vector<64x128xbf16>
    %cst_9 = arith.constant dense<0.000000e+00> : vector<256x128xf32>
    %11 = tpu.matmul %9, %10, %cst_9 {dimension_numbers = #tpu.dot_dimension_numbers<[1], [0], [0], [1], [0, 0, 1, 1], [], []>} : vector<256x64xbf16>, vector<64x128xbf16>, vector<256x128xf32> -> vector<256x128xf32>
    %c0_10 = arith.constant 0 : index
    %c0_11 = arith.constant 0 : index
    %12 = vector.load %arg7[%c0_10, %c0_11] : memref<1x128xf32, #tpu.memory_space<vmem>>, vector<1x128xf32>
    %13 = vector.broadcast %12 : vector<1x128xf32> to vector<256x128xf32>
    %14 = arith.addf %11, %13 : vector<256x128xf32>
    %cst_12 = arith.constant 0.000000e+00 : f32
    %15 = vector.broadcast %cst_12 : f32 to vector<256x128xf32>
    %16 = arith.maximumf %14, %15 : vector<256x128xf32>
    %17 = arith.truncf %16 : vector<256x128xf32> to vector<256x128xbf16>
    %c0_13 = arith.constant 0 : index
    %c0_14 = arith.constant 0 : index
    %18 = vector.load %arg8[%c0_13, %c0_14] : memref<128x1024xbf16, #tpu.memory_space<vmem>>, vector<128x1024xbf16>
    %cst_15 = arith.constant dense<0.000000e+00> : vector<256x1024xf32>
    %19 = tpu.matmul %17, %18, %cst_15 {dimension_numbers = #tpu.dot_dimension_numbers<[1], [0], [0], [1], [0, 0, 1, 1], [], []>} : vector<256x128xbf16>, vector<128x1024xbf16>, vector<256x1024xf32> -> vector<256x1024xf32>
    %cst_16 = arith.constant dense<0xFF800000> : vector<1024xf32>
    %20 = vector.multi_reduction <maximumf>, %19, %cst_16 [0] : vector<256x1024xf32> to vector<1024xf32>
    %21 = vector.shape_cast %20 : vector<1024xf32> to vector<1x1024xf32>
    %c0_i32 = arith.constant 0 : i32
    %22 = arith.cmpi eq, %arg2, %c0_i32 : i32
    %23 = arith.extui %22 : i1 to i32
    %c0_i32_17 = arith.constant 0 : i32
    %24 = arith.cmpi ne, %23, %c0_i32_17 : i32
    scf.if %24 {
      %cst_24 = arith.constant 0xFF800000 : f32
      %31 = vector.broadcast %cst_24 : f32 to vector<1x1024xf32>
      %c0_25 = arith.constant 0 : index
      %c0_26 = arith.constant 0 : index
      %c0_27 = arith.constant 0 : index
      %32 = vector.load %arg9[%c0_25, %c0_26, %c0_27] : memref<1x1x1024xf32, #tpu.memory_space<vmem>>, vector<1x1x1024xf32>
      %33 = vector.shape_cast %32 : vector<1x1x1024xf32> to vector<1x1024xf32>
      %34 = vector.shape_cast %31 : vector<1x1024xf32> to vector<1x1x1024xf32>
      tpu.vector_store %arg9[%c0_25, %c0_26, %c0_27], %34 {strides = array<i32>} : memref<1x1x1024xf32, #tpu.memory_space<vmem>>, vector<1x1x1024xf32>,
    } else {
    }
    %c0_18 = arith.constant 0 : index
    %c0_19 = arith.constant 0 : index
    %c0_20 = arith.constant 0 : index
    %25 = vector.load %arg9[%c0_18, %c0_19, %c0_20] : memref<1x1x1024xf32, #tpu.memory_space<vmem>>, vector<1x1x1024xf32>
    %26 = vector.shape_cast %25 : vector<1x1x1024xf32> to vector<1x1024xf32>
    %27 = arith.maximumf %26, %21 : vector<1x1024xf32>
    %c0_21 = arith.constant 0 : index
    %c0_22 = arith.constant 0 : index
    %c0_23 = arith.constant 0 : index
    %28 = vector.load %arg9[%c0_21, %c0_22, %c0_23] : memref<1x1x1024xf32, #tpu.memory_space<vmem>>, vector<1x1x1024xf32>
    %29 = vector.shape_cast %28 : vector<1x1x1024xf32> to vector<1x1024xf32>
    %30 = vector.shape_cast %27 : vector<1x1024xf32> to vector<1x1x1024xf32>
    tpu.vector_store %arg9[%c0_21, %c0_22, %c0_23], %30 {strides = array<i32>} : memref<1x1x1024xf32, #tpu.memory_space<vmem>>, vector<1x1x1024xf32>,
    return
  }
  func.func @transform_0(%arg0: i32, %arg1: i32, %arg2: i32) -> (i32, i32, i32) {
    %c1_i32 = arith.constant 1 : i32
    %0 = arith.muli %arg1, %c1_i32 : i32
    %1 = arith.addi %0, %arg2 : i32
    %c0_i32 = arith.constant 0 : i32
    %c0_i32_0 = arith.constant 0 : i32
    return %arg0, %1, %c0_i32 : i32, i32, i32
  }
  func.func @transform_1(%arg0: i32, %arg1: i32, %arg2: i32) -> (i32, i32) {
    %c0_i32 = arith.constant 0 : i32
    %c0_i32_0 = arith.constant 0 : i32
    %c0_i32_1 = arith.constant 0 : i32
    return %c0_i32, %c0_i32_0 : i32, i32
  }
  func.func @transform_2(%arg0: i32, %arg1: i32, %arg2: i32) -> (i32, i32) {
    %c0_i32 = arith.constant 0 : i32
    %c0_i32_0 = arith.constant 0 : i32
    %c0_i32_1 = arith.constant 0 : i32
    return %c0_i32, %c0_i32_0 : i32, i32
  }
  func.func @transform_3(%arg0: i32, %arg1: i32, %arg2: i32) -> (i32, i32) {
    %c0_i32 = arith.constant 0 : i32
    %c0_i32_0 = arith.constant 0 : i32
    %c0_i32_1 = arith.constant 0 : i32
    return %c0_i32, %c0_i32_0 : i32, i32
  }
  func.func @transform_4(%arg0: i32, %arg1: i32, %arg2: i32) -> (i32, i32) {
    %c0_i32 = arith.constant 0 : i32
    %c0_i32_0 = arith.constant 0 : i32
    %c0_i32_1 = arith.constant 0 : i32
    return %c0_i32, %c0_i32_0 : i32, i32
  }
  func.func @transform_5(%arg0: i32, %arg1: i32, %arg2: i32) -> (i32, i32) {
    %c0_i32 = arith.constant 0 : i32
    %c0_i32_0 = arith.constant 0 : i32
    %c0_i32_1 = arith.constant 0 : i32
    return %c0_i32, %c0_i32_0 : i32, i32
  }
  func.func @transform_6(%arg0: i32, %arg1: i32, %arg2: i32) -> (i32, i32, i32) {
    %c0_i32 = arith.constant 0 : i32
    %c0_i32_0 = arith.constant 0 : i32
    return %arg0, %arg1, %c0_i32 : i32, i32, i32
  }
}

</mosaic_0001>

<bundles_post_ra>
// kernel: tpu_custom_call.1
= control target key start
LH: loop header
LB: loop body
LE: loop exit
PB: predicated region body
PF: predicated region fallthrough
CT: control target
= control target key end

     0   :  { %11 = vsyncpa [#allocation3], 0  ;;  %s3587_s0 = inlined_call_operand.vmem [shape: bf16[2,256,3], index: 0, kind: input, shape index: {}]   ;;  %s3588_s1 = inlined_call_operand.vmem [shape: bf16[3,64], index: 1, kind: input, shape index: {}]   ;;  %s3589_s2 = inlined_call_operand.vmem [shape: f32[1,64], index: 2, kind: input, shape index: {}]   ;;  %s3590_s3 = inlined_call_operand.vmem [shape: bf16[64,128], index: 3, kind: input, shape index: {}]   ;;  %s3591_s4 = inlined_call_operand.vmem [shape: f32[1,128], index: 4, kind: input, shape index: {}]   ;;  %s3592_s5 = inlined_call_operand.hbm [shape: bf16[128,1024], index: 5, kind: input, shape index: {}]   ;;  %s3593_s6 = inlined_call_operand.hbm [shape: f32[2,1,1024], index: 6, kind: output, shape index: {}]  }
   0x1   :  { %12 = vsyncpa [#allocation4], 0 }
   0x2   :  { %14 = vsyncpa [#allocation4 + $0x1], 0  ;;  %s3110_s21 = smov 0   ;;  %s3112_s22 = smov 0  }
   0x3   :  { %s3114_s23 = smov 0   ;;  %s3116_s24 = smov 0  }
   0x4   :  { %s3118_s25 = smov 0   ;;  %s3120_s26 = smov 0  }
   0x5 LB: > { %s2618_s27 = sadd.s32 4294967295, %s3066_s26   ;;  %s2619_s28 = sadd.s32 4294967294, %s3066_s26   ;;  %s3066_s26 = sphi %s3120_s26, %s20_s26   ;;  %s3062_s25 = sphi %s3118_s25, %s3611_s25   ;;  %s3058_s24 = sphi %s3116_s24, %s3610_s24   ;;  %s3054_s23 = sphi %s3114_s23, %s3609_s23   ;;  %s3050_s22 = sphi %s3112_s22, %s3608_s22   ;;  %s3046_s21 = sphi %s3110_s21, %s3607_s21  }
   0x6   : > { %s39_s29 = sadd.s32 1, %s3062_s25  ;;  %s183_s30 = sadd.s32 1, %s3054_s23 }
   0x7   : > { %p41_p0 = scmp.ge.s32.totalorder %s39_s29, 2  ;;  %p193_p1 = scmp.ne.s32.totalorder %s3054_s23, %s3050_s22 }
   0x8   : > { %p194_p2 = scmp.eq.s32.totalorder %s2618_s27, 1  ;;  %p199_p3 = scmp.ne.s32.totalorder %s3050_s22, %s3046_s21 }
   0x9   : > { %s3613_s29 = smov (%p41_p0, %s39_s29), 0  ;;  %p200_p5 = scmp.eq.s32.totalorder %s2619_s28, 1 }
   0xa   : > { %p3150_p4 = por %p194_p2, %p193_p1  ;;  %s178_s8 = ssub.s32 %s3062_s25, %s3613_s29 }
   0xb   : > { %p2620_p6 = scmp.ge.s32.totalorder %s3066_s26, 1  ;;  %p181_p7 = scmp.eq.s32.totalorder %s178_s8, 0 }
   0xc   : > { %s3598_s7 = scalar_select %p3150_p4, 1, 0 }
   0xd   : > { %p3157_p8 = por %p200_p5, %p199_p3  ;;  %p207_p9 = scmp.lt.s32.totalorder %s3066_s26, 3 }
   0xe   : > { %s3163_s10 = scalar_select %p181_p7, %s3054_s23, %s183_s30  }
   0xf   : > { %s3599_s9 = scalar_select %p3157_p8, 1, 0 }
  0x10   : > { %p3165_p10 = pnand %p2620_p6, %p207_p9  ;;  %p3169_p11 = scmp.eq.s32.totalorder %s2618_s27, 0 }
  0x11   : > { %s3068_s13 = smov [#allocation2]   ;;  %s2956_s18 = scalar_lea.hbm %s3592_s5, 8192 }
  0x12   : > { %s3600_s11 = scalar_select %p3165_p10, 1, 0 }
  0x13   : > { %s3601_s12 = scalar_select %p3169_p11, 1, 0 }
  0x14   : > { %p2870_p12 = pneg %p3165_p10  ;;  %s231_s14 = sshll.u32 %s3068_s13, 4  ;;  %s232_s14 = int_to_ptr.vmem [resolvable:$true] %s231_s14 }
  0x15   : > { %p2957_p0 = scmp.ne.s32.totalorder %s3592_s5, %s2956_s18  ;;  %p2963_p5 = scmp.lt.u32.totalorder %s2956_s18, %s3592_s5 }
  0x16   : > { %p3177_p13 = pnand %p3169_p11, %p2870_p12 }
  0x18   : > { %p2958_p1 = pneg %p3177_p13 }
  0x1a   : > { %p2959_p2 = pnand %p2958_p1, %p2957_p0 }
  0x1c   : > { %p2960_p3 = pneg %p2959_p2 }
  0x1e   : > { %p2965_p6 = pnand %p2963_p5, %p2960_p3 }
  0x20   : > { %2968 = shalt.err (!%p2965_p6)
}
  0x21   : > { %s2969_s30 = scalar_lea.vmem %s232_s14, 8192  ;;  %p2977_p8 = scmp.lt.s32.totalorder %s232_s14, %s232_s14 }
  0x22   : > { %p2970_p7 = scmp.ne.s32.totalorder %s232_s14, %s2969_s30  ;;  %p2978_p4 = scmp.lt.s32.totalorder %s2969_s30, %s2969_s30 }
  0x24   : > { %p2972_p9 = pnand %p2970_p7, %p2958_p1  ;;  %p2979_p11 = por %p2978_p4, %p2977_p8 }
  0x26   : > { %p2973_p12 = pneg %p2972_p9 }
  0x28   : > { %p2980_p10 = pnand %p2979_p11, %p2973_p12 }
  0x2a   : > { %2983 = shalt.err (!%p2980_p10)
}
  0x2b   : > { %s3069_s8 = smov 512   ;;  %s3070_s13 = smov 32  }
  0x2c   : > { %2873 = dma.hbm_to_vmem [thread:$0]  (!%p3177_p13), %s3592_s5, 8192, %s232_s14, [#allocation3], %s3069_s8, %s3069_s8, %s3070_s13  }
  0x2d   : > { %p3603_p0 = scmp.ne.s32.totalorder %s3600_s11, 0 }
  0x2e   : > { %p3604_p2 = scmp.ne.s32.totalorder (!%p3603_p0), %s3601_s12, 0 }
  0x2f   : > { %262 = sbr.rel (%p3603_p0) target bundleno = 1008 (0x3f0), region = 44 }
  0x36   : > { %3037 = dma.done.wait (%p3604_p2), [#allocation3], 8192  }
  0x37   : > { %3039 = vsyncadd (%p3604_p2), [#allocation3], 4294959104  ;;  %vm479_vm0 = vcmask 1040384   ;;  %p299_p4 = scmp.lt.s32.totalorder %s3058_s24, 1  ;;  %vm480_vm1 = vcmask 1041408   ;;  %v3071_v0 = vmov 65535  }
  0x38   : > { %v481_v1 = vsel %vm479_vm0, 4294967295, %v3071_v0  ;;  %vm430_vm2 = vcmask 23552   ;;  %v342_v3 = vld [vmem:[%s3588_s1] sm:$0x3]  ;;  %v2953_v11 = vld [vmem:[%s3590_s3 + $0x8] sm:$0xff]   ;;  %v2954_v23 = vld [vmem:[%s3590_s3 + $0x10] sm:$0xff]  }
  0x39   : > { %s300_s15 = scalar_select %p299_p4, %s3058_s24, 1  ;;  %v482_v2 = vsel %vm480_vm1, %v481_v1, 0  ;;  %v2952_v10 = vld [vmem:[%s3590_s3] sm:$0xff]   ;;  %v2955_v24 = vld [vmem:[%s3590_s3 + $0x18] sm:$0xff]   ;;  %v3257_v27 = vld [vmem:[#allocation2 + $0x8] sm:$0xff]  ;;  %vm734_vm3 = vcmask 523264  }
  0x3a   : > { %v484_v4 = vand.u32 %v482_v2, %v342_v3  ;;  %2824 = vmatprep.subr.bf16.mxu1 %v2952_v10  ;;  %v992_v25 = vld [vmem:[#allocation2] sm:$0xff]  ;;  %v3259_v30 = vld [vmem:[#allocation2 + $0x28] sm:$0xff]  ;;  %s294_s12 = sand.u32 1, %s3050_s22   ;;  %s2752_s27 = sshll.u32 %s3058_s24, 7 }
  0x3b   : > { %s2751_s18 = sshll.u32 %s300_s15, 7  ;;  %2825 = vmatpush3.bf16.msra.mxu1 %v2952_v10  ;;  %v996_v26 = vld [vmem:[#allocation2 + $0x20] sm:$0xff]  ;;  %v2684_v33 = vcombine.low %v3257_v27, %v3259_v30  ;;  %v2685_v34 = vcombine.high %v3257_v27, %v3259_v30  ;;  %s2625_s20 = sshll.u32 %s294_s12, 3 }
  0x3c   : > { %s3208_s11 = scalar_lea.vmem %s3587_s0, %s2751_s18  ;;  %2790 = vmatprep.subr.bf16.mxu0 %v484_v4  ;;  %2826 = vmatprep.subr.bf16.mxu1 %v2953_v11  ;;  %v2682_v28 = vcombine.low %v992_v25, %v996_v26  ;;  %v2683_v29 = vcombine.high %v992_v25, %v996_v26  ;;  %v1000_v31 = vld [vmem:[#allocation2 + $0x40] sm:$0xff]  ;;  %s296_s28 = scalar_lea.vmem [#allocation5], %s2625_s20 }
  0x3d   : > { %v2936_v5 = vld [vmem:[%s3208_s11] sm:$0xff]   ;;  %v2937_v6 = vld [vmem:[%s3208_s11 + $0x8] sm:$0xff]   ;;  %2791 = vmatpush3.bf16.msra.mxu0 %v484_v4  ;;  %v2938_v7 = vld [vmem:[%s3208_s11 + $0x10] sm:$0xff]   ;;  %s2527_s30 = sshll.u32 %s296_s28, 4  ;;  %s3540_s16 = scalar_lea.hbm %s3593_s6, %s2752_s27  ;;  %s3542_s30 = int_to_ptr.vmem [resolvable:$true] %s2527_s30 }
  0x3e   : > { %2792 = vmatprep.mubr.msk.bf16.mxu0 %vm430_vm2, %v2936_v5  ;;  %v2939_v8 = vld [vmem:[%s3208_s11 + $0x18] sm:$0xff]   ;;  %v2940_v9 = vld [vmem:[%s3208_s11 + $0x20] sm:$0xff]   ;;  %v2941_v12 = vld [vmem:[%s3208_s11 + $0x28] sm:$0xff]   ;;  %1376 = vmatprep.subr.bf16.mxu0 %v2683_v29  ;;  %s2511_s17 = scalar_lea.sflag [#allocation4], %s294_s12  ;;  %s2984_s15 = scalar_lea.vmem %s3542_s30, 128 }
  0x3f   : > { %v2942_v13 = vld [vmem:[%s3208_s11 + $0x30] sm:$0xff]   ;;  %2827 = vmatpush3.bf16.msra.mxu1 %v2953_v11  ;;  %v2943_v14 = vld [vmem:[%s3208_s11 + $0x38] sm:$0xff]   ;;  %v2944_v15 = vld [vmem:[%s3208_s11 + $0x40] sm:$0xff]   ;;  %p2985_p8 = scmp.ne.s32.totalorder %s3542_s30, %s2984_s15  ;;  %p3605_p10 = scmp.ne.s32.totalorder %s3598_s7, 0 }
  0x40   : > { %2793 = vmatmul.mubr.msk.bf16.vlgmr.msra.gmra.mrb[0].mxu0 %vm430_vm2, %v2937_v6  ;;  %v2945_v16 = vld [vmem:[%s3208_s11 + $0x48] sm:$0xff]   ;;  %v2946_v17 = vld [vmem:[%s3208_s11 + $0x50] sm:$0xff]   ;;  %v2947_v18 = vld [vmem:[%s3208_s11 + $0x58] sm:$0xff]   ;;  %2828 = vmatprep.subr.bf16.mxu1 %v2954_v23  ;;  %s3074_s24 = smov [#allocation5]  }
  0x41   : > { %2796 = vmatprep.mubr.msk.bf16.mxu0 %vm430_vm2, %v2938_v7  ;;  %v2948_v19 = vld [vmem:[%s3208_s11 + $0x60] sm:$0xff]   ;;  %v2949_v20 = vld [vmem:[%s3208_s11 + $0x68] sm:$0xff]   ;;  %v2950_v21 = vld [vmem:[%s3208_s11 + $0x70] sm:$0xff]   ;;  %1377 = vmatpush1.bf16.msra.mxu0 %v2682_v28  ;;  %p2986_p11 = pnand %p2985_p8, %p3605_p10  ;;  %s2988_s18 = sshll.u32 %s3074_s24, 4  ;;  %s2989_s18 = int_to_ptr.vmem [resolvable:$false] %s2988_s18 }
  0x42   : > { %v2951_v22 = vld [vmem:[%s3208_s11 + $0x78] sm:$0xff]   ;;  %v1004_v32 = vld [vmem:[#allocation2 + $0x60] sm:$0xff]  ;;  %v1001_v6 = vld [vmem:[#allocation2 + $0x48] sm:$0xff]  ;;  %s2990_s14 = scalar_lea.vmem %s2989_s18, 256  ;;  %p2991_p1 = scmp.lt.s32.totalorder %s3542_s30, %s2989_s18 }
  0x43   : > { %2829 = vmatpush3.bf16.msra.mxu1 %v2954_v23  ;;  %v2691_v35 = vcombine.high %v1000_v31, %v1004_v32  ;;  %v1008_v36 = vld [vmem:[#allocation2 + $0x80] sm:$0xff]  ;;  %v2690_v38 = vcombine.low %v1000_v31, %v1004_v32  ;;  %v1005_v7 = vld [vmem:[#allocation2 + $0x68] sm:$0xff]  ;;  %p2987_p13 = pneg %p2986_p11  ;;  %p2992_p3 = scmp.lt.s32.totalorder %s2990_s14, %s2984_s15 }
  0x44   : > { %2830 = vmatprep.subr.bf16.mxu1 %v2955_v24  ;;  %v1012_v37 = vld [vmem:[#allocation2 + $0xa0] sm:$0xff]  ;;  %v2692_v23 = vcombine.low %v1001_v6, %v1005_v7  ;;  %v1017_v28 = vld [vmem:[#allocation2 + $0xc8] sm:$0xff] }
  0x45   : > { %1378 = vmatprep.subr.bf16.mxu0 %v2691_v35  ;;  %v2699_v39 = vcombine.high %v1008_v36, %v1012_v37  ;;  %v1016_v40 = vld [vmem:[#allocation2 + $0xc0] sm:$0xff]  ;;  %v2698_v42 = vcombine.low %v1008_v36, %v1012_v37  ;;  %v1021_v29 = vld [vmem:[#allocation2 + $0xe8] sm:$0xff]  ;;  %p2993_p5 = por %p2992_p3, %p2991_p1 }
  0x46   : > { %v1020_v41 = vld [vmem:[#allocation2 + $0xe0] sm:$0xff]  ;;  %1379 = vmatpush1.bf16.msra.mxu0 %v2690_v38  ;;  %v2709_v38 = vcombine.high %v1017_v28, %v1021_v29 }
  0x47   : > { %2831 = vmatpush3.bf16.msra.mxu1 %v2955_v24  ;;  %1380 = vmatprep.subr.bf16.mxu0 %v2699_v39  ;;  %v2707_v43 = vcombine.high %v1016_v40, %v1020_v41  ;;  %v1024_v44 = vld [vmem:[#allocation2 + $0x100] sm:$0xff]  ;;  %v2706_v46 = vcombine.low %v1016_v40, %v1020_v41  ;;  %v1029_v39 = vld [vmem:[#allocation2 + $0x128] sm:$0xff]  ;;  %p2994_p6 = pnand %p2993_p5, %p2987_p13 }
  0x48   : > { %2797 = vmatmul.mubr.msk.bf16.gmra.mrb[4].mxu0 %vm430_vm2, %v2939_v8  ;;  %1569 = vmatprep.subr.bf16.mxu1 %v2685_v34  ;;  %v1028_v45 = vld [vmem:[#allocation2 + $0x120] sm:$0xff] }
  0x49   : > { %2800 = vmatprep.mubr.msk.bf16.mxu0 %vm430_vm2, %v2940_v9  ;;  %v2715_v47 = vcombine.high %v1024_v44, %v1028_v45  ;;  %v1032_v48 = vld [vmem:[#allocation2 + $0x140] sm:$0xff]  ;;  %v2714_v50 = vcombine.low %v1024_v44, %v1028_v45  ;;  %v2708_v45 = vcombine.low %v1017_v28, %v1021_v29 }
  0x4a   : > { %1381 = vmatpush1.bf16.msra.mxu0 %v2698_v42  ;;  %v1036_v49 = vld [vmem:[#allocation2 + $0x160] sm:$0xff] }
  0x4b   : > { %1382 = vmatprep.subr.bf16.mxu0 %v2707_v43  ;;  %v2723_v51 = vcombine.high %v1032_v48, %v1036_v49  ;;  %v1040_v52 = vld [vmem:[#allocation2 + $0x180] sm:$0xff]  ;;  %v2722_v54 = vcombine.low %v1032_v48, %v1036_v49  ;;  %v1033_v49 = vld [vmem:[#allocation2 + $0x148] sm:$0xff] }
  0x4c   : > { %v1044_v53 = vld [vmem:[#allocation2 + $0x1a0] sm:$0xff] }
  0x4d   : > { %v2731_v55 = vcombine.high %v1040_v52, %v1044_v53  ;;  %v2730_v56 = vcombine.low %v1040_v52, %v1044_v53  ;;  %v3268_v57 = vld [vmem:[%s3589_s2] ss:$0 sm:$0xff] }
  0x4e   : > { %1383 = vmatpush1.bf16.msra.mxu0 %v2706_v46 }
  0x4f   : > { %1384 = vmatprep.subr.bf16.mxu0 %v2715_v47 }
  0x50   : > { %2801 = vmatmul.mubr.msk.bf16.gmra.mrb[8].mxu0 %vm430_vm2, %v2941_v12 }
  0x51   : > { %2804 = vmatprep.mubr.msk.bf16.mxu0 %vm430_vm2, %v2942_v13  ;;  %v2693_v13 = vcombine.high %v1001_v6, %v1005_v7 }
  0x52   : > { %1385 = vmatpush1.bf16.msra.mxu0 %v2714_v50  ;;  %v1037_v50 = vld [vmem:[#allocation2 + $0x168] sm:$0xff] }
  0x53   : > { %1386 = vmatprep.subr.bf16.mxu0 %v2723_v51 }
  0x56   : > { %1387 = vmatpush1.bf16.msra.mxu0 %v2722_v54 }
  0x57   : > { %1388 = vmatprep.subr.bf16.mxu0 %v2731_v55 }
  0x58   : > { %2805 = vmatmul.mubr.msk.bf16.gmra.mrb[12].mxu0 %vm430_vm2, %v2943_v14 }
  0x59   : > { %2808 = vmatprep.mubr.msk.bf16.mxu0 %vm430_vm2, %v2944_v15 }
  0x5a   : > { %1389 = vmatpush1.bf16.msra.mxu0 %v2730_v56 }
  0x60   : > { %2809 = vmatmul.mubr.msk.bf16.gmra.mrb[16].mxu0 %vm430_vm2, %v2945_v16  ;;  %v1009_v16 = vld [vmem:[#allocation2 + $0x88] sm:$0xff] }
  0x61   : > { %2812 = vmatprep.mubr.msk.bf16.mxu0 %vm430_vm2, %v2946_v17  ;;  %v1013_v17 = vld [vmem:[#allocation2 + $0xa8] sm:$0xff] }
  0x62   : > { %v2701_v25 = vcombine.high %v1009_v16, %v1013_v17  ;;  %v2700_v35 = vcombine.low %v1009_v16, %v1013_v17 }
  0x68   : > { %2813 = vmatmul.mubr.msk.bf16.gmra.mrb[20].mxu0 %vm430_vm2, %v2947_v18 }
  0x69   : > { %2816 = vmatprep.mubr.msk.bf16.mxu0 %vm430_vm2, %v2948_v19 }
  0x70   : > { %2817 = vmatmul.mubr.msk.bf16.gmra.mrb[24].mxu0 %vm430_vm2, %v2949_v20 }
  0x71   : > { %2820 = vmatprep.mubr.msk.bf16.mxu0 %vm430_vm2, %v2950_v21 }
  0x78   : > { %2821 = vmatmul.mubr.msk.bf16.gmra.mrb[28].mxu0 %vm430_vm2, %v2951_v22 }
 0x113   : > { %v2794_v58 = vpop.f32.mrb[0].mxu0 }
 0x114   : > { %v529_v59 = vadd.f32 %v2794_v58, %v3268_v57  ;;  %v520_v60 = vpop.f32.mrb[1].mxu0  ;;  %v2725_v58 = vcombine.high %v1033_v49, %v1037_v50 }
 0x115   : > { %v521_v61 = vadd.f32 %v3268_v57, %v520_v60  ;;  %v2795_v62 = vpop.f32.mrb[2].mxu0 }
 0x116   : > { %v532_v63 = vadd.f32 %v2795_v62, %v3268_v57  ;;  %v523_v0 = vpop.f32.mrb[3].mxu0  ;;  %v649_v2 = vmax.f32 %v529_v59, 0.0  ;;  %v1045_v62 = vld [vmem:[#allocation2 + $0x1a8] sm:$0xff] }
 0x117   : > { %v524_v1 = vadd.f32 %v3268_v57, %v523_v0  ;;  %v647_v4 = vmax.f32 %v521_v61, 0.0  ;;  %v1041_v61 = vld [vmem:[#allocation2 + $0x188] sm:$0xff] }
 0x118   : > { %v650_v3 = vmax.f32 %v532_v63, 0.0  ;;  %v2733_v6 = vcombine.high %v1041_v61, %v1045_v62 }
 0x119   : > { %v648_v5 = vmax.f32 %v524_v1, 0.0 }
 0x11a   : > { %v680_v8 = vpack.c.bf16 %v650_v3, %v649_v2 }
 0x11b   : > { %v2798_v9 = vpop.f32.mrb[4].mxu0  ;;  %v679_v10 = vpack.c.bf16 %v648_v5, %v647_v4  ;;  %v2724_v4 = vcombine.low %v1033_v49, %v1037_v50 }
 0x11c   : > { %v545_v11 = vadd.f32 %v2798_v9, %v3268_v57  ;;  %v536_v12 = vpop.f32.mrb[5].mxu0 }
 0x11d   : > { %v537_v14 = vadd.f32 %v3268_v57, %v536_v12  ;;  %2832 = vmatprep.mubr.msk.bf16.mxu1 %vm734_vm3, %v679_v10  ;;  %v2799_v15 = vpop.f32.mrb[6].mxu0 }
 0x11e   : > { %v653_v18 = vmax.f32 %v545_v11, 0.0  ;;  %v548_v19 = vadd.f32 %v2799_v15, %v3268_v57  ;;  %2833 = vmatmul.mubr.msk.bf16.vlgmr.msra.gmra.mrb[0].mxu1 %vm734_vm3, %v680_v8  ;;  %v539_v20 = vpop.f32.mrb[7].mxu0  ;;  %v2732_v11 = vcombine.low %v1041_v61, %v1045_v62 }
 0x11f   : > { %v651_v21 = vmax.f32 %v537_v14, 0.0  ;;  %v540_v22 = vadd.f32 %v3268_v57, %v539_v20  ;;  %1570 = vmatpush1.bf16.msra.mxu1 %v2684_v33  ;;  %v1025_v33 = vld [vmem:[#allocation2 + $0x108] sm:$0xff] }
 0x120   : > { %v654_v24 = vmax.f32 %v548_v19, 0.0  ;;  %1571 = vmatprep.subr.bf16.mxu1 %v2693_v13  ;;  %v2717_v47 = vcombine.high %v1025_v33, %v1029_v39  ;;  %v2716_v54 = vcombine.low %v1025_v33, %v1029_v39 }
 0x121   : > { %v652_v26 = vmax.f32 %v540_v22, 0.0 }
 0x122   : > { %v682_v31 = vpack.c.bf16 %v654_v24, %v653_v18 }
 0x123   : > { %v681_v32 = vpack.c.bf16 %v652_v26, %v651_v21  ;;  %v2802_v34 = vpop.f32.mrb[8].mxu0  ;;  %1572 = vmatpush1.bf16.msra.mxu1 %v2692_v23 }
 0x124   : > { %v561_v36 = vadd.f32 %v2802_v34, %v3268_v57  ;;  %v552_v37 = vpop.f32.mrb[9].mxu0  ;;  %1573 = vmatprep.subr.bf16.mxu1 %v2701_v25 }
 0x125   : > { %2836 = vmatprep.mubr.msk.bf16.mxu1 %vm734_vm3, %v681_v32  ;;  %v553_v27 = vadd.f32 %v3268_v57, %v552_v37  ;;  %v2803_v30 = vpop.f32.mrb[10].mxu0 }
 0x126   : > { %2837 = vmatmul.mubr.msk.bf16.gmra.mrb[4].mxu1 %vm734_vm3, %v682_v31  ;;  %v657_v40 = vmax.f32 %v561_v36, 0.0  ;;  %v564_v41 = vadd.f32 %v2803_v30, %v3268_v57  ;;  %v555_v42 = vpop.f32.mrb[11].mxu0 }
 0x127   : > { %v655_v43 = vmax.f32 %v553_v27, 0.0  ;;  %v556_v44 = vadd.f32 %v3268_v57, %v555_v42  ;;  %1574 = vmatpush1.bf16.msra.mxu1 %v2700_v35 }
 0x128   : > { %v658_v46 = vmax.f32 %v564_v41, 0.0  ;;  %1575 = vmatprep.subr.bf16.mxu1 %v2709_v38 }
 0x129   : > { %v656_v48 = vmax.f32 %v556_v44, 0.0 }
 0x12a   : > { %v684_v51 = vpack.c.bf16 %v658_v46, %v657_v40 }
 0x12b   : > { %v683_v52 = vpack.c.bf16 %v656_v48, %v655_v43  ;;  %v2806_v53 = vpop.f32.mrb[12].mxu0  ;;  %1576 = vmatpush1.bf16.msra.mxu1 %v2708_v45 }
 0x12c   : > { %v577_v55 = vadd.f32 %v2806_v53, %v3268_v57  ;;  %v568_v56 = vpop.f32.mrb[13].mxu0  ;;  %1577 = vmatprep.subr.bf16.mxu1 %v2717_v47 }
 0x12d   : > { %2840 = vmatprep.mubr.msk.bf16.mxu1 %vm734_vm3, %v683_v52  ;;  %v569_v59 = vadd.f32 %v3268_v57, %v568_v56  ;;  %v2807_v60 = vpop.f32.mrb[14].mxu0 }
 0x12e   : > { %2841 = vmatmul.mubr.msk.bf16.gmra.mrb[8].mxu1 %vm734_vm3, %v684_v51  ;;  %v661_v63 = vmax.f32 %v577_v55, 0.0  ;;  %v580_v0 = vadd.f32 %v2807_v60, %v3268_v57  ;;  %v571_v1 = vpop.f32.mrb[15].mxu0 }
 0x12f   : > { %v659_v2 = vmax.f32 %v569_v59, 0.0  ;;  %v572_v3 = vadd.f32 %v3268_v57, %v571_v1  ;;  %1578 = vmatpush1.bf16.msra.mxu1 %v2716_v54 }
 0x130   : > { %v662_v5 = vmax.f32 %v580_v0, 0.0  ;;  %1579 = vmatprep.subr.bf16.mxu1 %v2725_v58 }
 0x131   : > { %v660_v7 = vmax.f32 %v572_v3, 0.0 }
 0x132   : > { %v686_v8 = vpack.c.bf16 %v662_v5, %v661_v63  ;;  %v1052_v5 = vld [vmem:[#allocation2 + $0x1e0] sm:$0xff] }
 0x133   : > { %v685_v9 = vpack.c.bf16 %v660_v7, %v659_v2  ;;  %v2810_v10 = vpop.f32.mrb[16].mxu0  ;;  %1580 = vmatpush1.bf16.msra.mxu1 %v2724_v4  ;;  %v1048_v4 = vld [vmem:[#allocation2 + $0x1c0] sm:$0xff] }
 0x134   : > { %v593_v12 = vadd.f32 %v2810_v10, %v3268_v57  ;;  %v584_v13 = vpop.f32.mrb[17].mxu0  ;;  %1581 = vmatprep.subr.bf16.mxu1 %v2733_v6  ;;  %v1049_v6 = vld [vmem:[#allocation2 + $0x1c8] sm:$0xff]  ;;  %v2738_v7 = vcombine.low %v1048_v4, %v1052_v5 }
 0x135   : > { %2844 = vmatprep.mubr.msk.bf16.mxu1 %vm734_vm3, %v685_v9  ;;  %v585_v14 = vadd.f32 %v3268_v57, %v584_v13  ;;  %v2811_v15 = vpop.f32.mrb[18].mxu0  ;;  %v1053_v9 = vld [vmem:[#allocation2 + $0x1e8] sm:$0xff]  ;;  %v998_v13 = vld [vmem:[#allocation2 + $0x30] sm:$0xff] }
 0x136   : > { %2845 = vmatmul.mubr.msk.bf16.gmra.mrb[12].mxu1 %vm734_vm3, %v686_v8  ;;  %v665_v16 = vmax.f32 %v593_v12, 0.0  ;;  %v596_v17 = vadd.f32 %v2811_v15, %v3268_v57  ;;  %v587_v18 = vpop.f32.mrb[19].mxu0  ;;  %v2739_v8 = vcombine.high %v1048_v4, %v1052_v5  ;;  %v2740_v10 = vcombine.low %v1049_v6, %v1053_v9  ;;  %v994_v12 = vld [vmem:[#allocation2 + $0x10] sm:$0xff] }
 0x137   : > { %v663_v19 = vmax.f32 %v585_v14, 0.0  ;;  %v588_v20 = vadd.f32 %v3268_v57, %v587_v18  ;;  %1582 = vmatpush1.bf16.msra.mxu1 %v2732_v11  ;;  %v2741_v11 = vcombine.high %v1049_v6, %v1053_v9  ;;  %v995_v14 = vld [vmem:[#allocation2 + $0x18] sm:$0xff]  ;;  %v2686_v15 = vcombine.low %v994_v12, %v998_v13 }
 0x138   : > { %v666_v21 = vmax.f32 %v596_v17, 0.0  ;;  %1390 = vmatprep.subr.bf16.mxu0 %v2739_v8  ;;  %v999_v17 = vld [vmem:[#allocation2 + $0x38] sm:$0xff] }
 0x139   : > { %v664_v22 = vmax.f32 %v588_v20, 0.0  ;;  %1583 = vmatprep.subr.bf16.mxu1 %v2741_v11  ;;  %1391 = vmatpush1.bf16.msra.mxu0 %v2738_v7  ;;  %v2688_v18 = vcombine.low %v995_v14, %v999_v17  ;;  %v3326_v20 = vld [vmem:[%s3591_s4] ss:$0 sm:$0xff]  ;;  %v1026_v11 = vld [vmem:[#allocation2 + $0x110] sm:$0xff] }
 0x13a   : > { %v688_v23 = vpack.c.bf16 %v666_v21, %v665_v16  ;;  %v2687_v16 = vcombine.high %v994_v12, %v998_v13 }
 0x13b   : > { %v687_v24 = vpack.c.bf16 %v664_v22, %v663_v19  ;;  %v2814_v25 = vpop.f32.mrb[20].mxu0  ;;  %1584 = vmatpush1.bf16.msra.mxu1 %v2740_v10  ;;  %v2689_v19 = vcombine.high %v995_v14, %v999_v17  ;;  %v1030_v14 = vld [vmem:[#allocation2 + $0x130] sm:$0xff] }
 0x13c   : > { %v609_v26 = vadd.f32 %v2814_v25, %v3268_v57  ;;  %v600_v28 = vpop.f32.mrb[21].mxu0  ;;  %1762 = vmatprep.subr.bf16.mxu0 %v2687_v16  ;;  %v1031_v16 = vld [vmem:[#allocation2 + $0x138] sm:$0xff] }
 0x13d   : > { %2848 = vmatprep.mubr.msk.bf16.mxu1 %vm734_vm3, %v687_v24  ;;  %v601_v29 = vadd.f32 %v3268_v57, %v600_v28  ;;  %v2815_v31 = vpop.f32.mrb[22].mxu0  ;;  %1955 = vmatprep.subr.bf16.mxu1 %v2689_v19 }
 0x13e   : > { %2849 = vmatmul.mubr.msk.bf16.gmra.mrb[16].mxu1 %vm734_vm3, %v688_v23  ;;  %v669_v32 = vmax.f32 %v609_v26, 0.0  ;;  %v612_v34 = vadd.f32 %v2815_v31, %v3268_v57  ;;  %v603_v35 = vpop.f32.mrb[23].mxu0 }
 0x13f   : > { %v667_v36 = vmax.f32 %v601_v29, 0.0  ;;  %v604_v37 = vadd.f32 %v3268_v57, %v603_v35 }
 0x140   : > { %v670_v38 = vmax.f32 %v612_v34, 0.0  ;;  %v1002_v34 = vld [vmem:[#allocation2 + $0x50] sm:$0xff] }
 0x141   : > { %v668_v27 = vmax.f32 %v604_v37, 0.0  ;;  %v1006_v37 = vld [vmem:[#allocation2 + $0x70] sm:$0xff] }
 0x142   : > { %v690_v30 = vpack.c.bf16 %v670_v38, %v669_v32  ;;  %v1003_v38 = vld [vmem:[#allocation2 + $0x58] sm:$0xff] }
 0x143   : > { %v689_v33 = vpack.c.bf16 %v668_v27, %v667_v36  ;;  %v2818_v39 = vpop.f32.mrb[24].mxu0  ;;  %v1007_v27 = vld [vmem:[#allocation2 + $0x78] sm:$0xff] }
 0x144   : > { %v625_v40 = vadd.f32 %v2818_v39, %v3268_v57  ;;  %v616_v41 = vpop.f32.mrb[25].mxu0 }
 0x145   : > { %2852 = vmatprep.mubr.msk.bf16.mxu1 %vm734_vm3, %v689_v33  ;;  %v617_v42 = vadd.f32 %v3268_v57, %v616_v41  ;;  %v2819_v43 = vpop.f32.mrb[26].mxu0 }
 0x146   : > { %2853 = vmatmul.mubr.msk.bf16.gmra.mrb[20].mxu1 %vm734_vm3, %v690_v30  ;;  %v673_v44 = vmax.f32 %v625_v40, 0.0  ;;  %v628_v45 = vadd.f32 %v2819_v43, %v3268_v57  ;;  %v619_v46 = vpop.f32.mrb[27].mxu0  ;;  %v1010_v40 = vld [vmem:[#allocation2 + $0x90] sm:$0xff]  ;;  %v2695_v43 = vcombine.high %v1002_v34, %v1006_v37 }
 0x147   : > { %v671_v47 = vmax.f32 %v617_v42, 0.0  ;;  %v620_v48 = vadd.f32 %v3268_v57, %v619_v46  ;;  %v1011_v46 = vld [vmem:[#allocation2 + $0x98] sm:$0xff] }
 0x148   : > { %v674_v49 = vmax.f32 %v628_v45, 0.0  ;;  %v1014_v45 = vld [vmem:[#allocation2 + $0xb0] sm:$0xff] }
 0x149   : > { %v672_v50 = vmax.f32 %v620_v48, 0.0  ;;  %v2702_v5 = vcombine.low %v1010_v40, %v1014_v45 }
 0x14a   : > { %v692_v51 = vpack.c.bf16 %v674_v49, %v673_v44  ;;  %v2697_v44 = vcombine.high %v1003_v38, %v1007_v27 }
 0x14b   : > { %v691_v52 = vpack.c.bf16 %v672_v50, %v671_v47  ;;  %v2822_v53 = vpop.f32.mrb[28].mxu0  ;;  %v1015_v47 = vld [vmem:[#allocation2 + $0xb8] sm:$0xff] }
 0x14c   : > { %v641_v54 = vadd.f32 %v2822_v53, %v3268_v57  ;;  %v632_v55 = vpop.f32.mrb[29].mxu0  ;;  %v2694_v53 = vcombine.low %v1002_v34, %v1006_v37  ;;  %v2704_v6 = vcombine.low %v1011_v46, %v1015_v47  ;;  %v1035_v34 = vld [vmem:[#allocation2 + $0x158] sm:$0xff] }
 0x14d   : > { %2856 = vmatprep.mubr.msk.bf16.mxu1 %vm734_vm3, %v691_v52  ;;  %v633_v56 = vadd.f32 %v3268_v57, %v632_v55  ;;  %v2823_v58 = vpop.f32.mrb[30].mxu0 }
 0x14e   : > { %2857 = vmatmul.mubr.msk.bf16.gmra.mrb[24].mxu1 %vm734_vm3, %v692_v51  ;;  %v677_v59 = vmax.f32 %v641_v54, 0.0  ;;  %v644_v60 = vadd.f32 %v2823_v58, %v3268_v57  ;;  %v635_v61 = vpop.f32.mrb[31].mxu0  ;;  %v2696_v54 = vcombine.low %v1003_v38, %v1007_v27  ;;  %v2703_v58 = vcombine.high %v1010_v40, %v1014_v45 }
 0x14f   : > { %v675_v62 = vmax.f32 %v633_v56, 0.0  ;;  %v636_v63 = vadd.f32 %v3268_v57, %v635_v61  ;;  %v3072_v57 = vmov 0   ;;  %v1018_v61 = vld [vmem:[#allocation2 + $0xd0] sm:$0xff]  ;;  %v2718_v27 = vcombine.low %v1026_v11, %v1030_v14 }
 0x150   : > { %v678_v0 = vmax.f32 %v644_v60, 0.0  ;;  %1408 = vmatprep.mubr.bf16.mxu0 %v3072_v57 }
 0x151   : > { %v676_v1 = vmax.f32 %v636_v63, 0.0  ;;  %v1022_v63 = vld [vmem:[#allocation2 + $0xf0] sm:$0xff] }
 0x152   : > { %v694_v2 = vpack.c.bf16 %v678_v0, %v677_v59  ;;  %v2705_v59 = vcombine.high %v1011_v46, %v1015_v47  ;;  %v1019_v0 = vld [vmem:[#allocation2 + $0xd8] sm:$0xff]  ;;  %v2711_v9 = vcombine.high %v1018_v61, %v1022_v63  ;;  %v1046_v47 = vld [vmem:[#allocation2 + $0x1b0] sm:$0xff] }
 0x153   : > { %v693_v3 = vpack.c.bf16 %v676_v1, %v675_v62  ;;  %v1023_v1 = vld [vmem:[#allocation2 + $0xf8] sm:$0xff] }
 0x154   : > { %v2713_v10 = vcombine.high %v1019_v0, %v1023_v1 }
 0x155   : > { %2860 = vmatprep.mubr.msk.bf16.mxu1 %vm734_vm3, %v693_v3 }
 0x156   : > { %2861 = vmatmul.mubr.msk.bf16.gmra.mrb[28].mxu1 %vm734_vm3, %v694_v2 }
 0x157   : > { %1601 = vmatprep.mubr.bf16.mxu1 %v3072_v57 }
 0x1f1   : > { %v2834_v21 = vpop.f32.mrb[0].mxu1 }
 0x1f2   : > { %v826_v22 = vadd.f32 %v2834_v21, %v3326_v20  ;;  %v817_v23 = vpop.f32.mrb[1].mxu1 }
 0x1f3   : > { %v818_v24 = vadd.f32 %v3326_v20, %v817_v23  ;;  %v2835_v25 = vpop.f32.mrb[2].mxu1  ;;  %v2710_v23 = vcombine.low %v1018_v61, %v1022_v63  ;;  %v1050_v61 = vld [vmem:[#allocation2 + $0x1d0] sm:$0xff] }
 0x1f4   : > { %v829_v26 = vadd.f32 %v2835_v25, %v3326_v20  ;;  %v820_v28 = vpop.f32.mrb[3].mxu1  ;;  %v946_v31 = vmax.f32 %v826_v22, 0.0  ;;  %v1054_v63 = vld [vmem:[#allocation2 + $0x1f0] sm:$0xff] }
 0x1f5   : > { %v821_v29 = vadd.f32 %v3326_v20, %v820_v28  ;;  %v944_v35 = vmax.f32 %v818_v24, 0.0  ;;  %v2712_v24 = vcombine.low %v1019_v0, %v1023_v1  ;;  %v1051_v0 = vld [vmem:[#allocation2 + $0x1d8] sm:$0xff] }
 0x1f6   : > { %v947_v32 = vmax.f32 %v829_v26, 0.0  ;;  %v2719_v26 = vcombine.high %v1026_v11, %v1030_v14  ;;  %v1055_v1 = vld [vmem:[#allocation2 + $0x1f8] sm:$0xff]  ;;  %v2743_v11 = vcombine.high %v1050_v61, %v1054_v63 }
 0x1f7   : > { %v945_v36 = vmax.f32 %v821_v29, 0.0  ;;  %v1034_v29 = vld [vmem:[#allocation2 + $0x150] sm:$0xff] }
 0x1f8   : > { %v3332_v30 = vpack.c.bf16 %v947_v32, %v946_v31  ;;  %v1038_v32 = vld [vmem:[#allocation2 + $0x170] sm:$0xff] }
 0x1f9   : > { %v3334_v33 = vpack.c.bf16 %v945_v36, %v944_v35  ;;  %v2838_v39 = vpop.f32.mrb[4].mxu1  ;;  %v1039_v35 = vld [vmem:[#allocation2 + $0x178] sm:$0xff] }
 0x1fa   : > { %v842_v41 = vadd.f32 %v2838_v39, %v3326_v20  ;;  %v833_v42 = vpop.f32.mrb[5].mxu1 }
 0x1fb   : > { %v834_v48 = vadd.f32 %v3326_v20, %v833_v42  ;;  %1409 = vmatmul.mubr.bf16.vlgmr.msra.gmra.mrb[32].mxu0 %v3334_v33  ;;  %1602 = vmatmul.mubr.bf16.vlgmr.msra.gmra.mrb[32].mxu1 %v3334_v33  ;;  %v2839_v49 = vpop.f32.mrb[6].mxu1  ;;  %v2727_v42 = vcombine.high %v1034_v29, %v1038_v32 }
 0x1fc   : > { %v950_v50 = vmax.f32 %v842_v41, 0.0  ;;  %1763 = vmatpush1.bf16.msra.mxu0 %v2686_v15  ;;  %1956 = vmatpush1.bf16.msra.mxu1 %v2688_v18  ;;  %v845_v51 = vadd.f32 %v2839_v49, %v3326_v20  ;;  %v836_v52 = vpop.f32.mrb[7].mxu1  ;;  %v1027_v15 = vld [vmem:[#allocation2 + $0x118] sm:$0xff] }
 0x1fd   : > { %v948_v55 = vmax.f32 %v834_v48, 0.0  ;;  %v837_v56 = vadd.f32 %v3326_v20, %v836_v52  ;;  %1418 = vmatprep.mubr.bf16.mxu0 %v3072_v57  ;;  %1611 = vmatprep.mubr.bf16.mxu1 %v3072_v57  ;;  %v2721_v28 = vcombine.high %v1027_v15, %v1031_v16  ;;  %v2720_v39 = vcombine.low %v1027_v15, %v1031_v16  ;;  %v1043_v48 = vld [vmem:[#allocation2 + $0x198] sm:$0xff] }
 0x1fe   : > { %v951_v60 = vmax.f32 %v845_v51, 0.0  ;;  %1764 = vmatprep.subr.bf16.mxu0 %v2695_v43  ;;  %1957 = vmatprep.subr.bf16.mxu1 %v2697_v44  ;;  %v2729_v43 = vcombine.high %v1035_v34, %v1039_v35  ;;  %v1042_v44 = vld [vmem:[#allocation2 + $0x190] sm:$0xff]  ;;  %v1047_v49 = vld [vmem:[#allocation2 + $0x1b8] sm:$0xff] }
 0x1ff   : > { %v949_v62 = vmax.f32 %v837_v56, 0.0  ;;  %v2728_v56 = vcombine.low %v1035_v34, %v1039_v35 }
 0x200   : > { %v3344_v2 = vpack.c.bf16 %v951_v60, %v950_v50  ;;  %1765 = vmatpush1.bf16.msra.mxu0 %v2694_v53  ;;  %1958 = vmatpush1.bf16.msra.mxu1 %v2696_v54  ;;  %v2737_v60 = vcombine.high %v1043_v48, %v1047_v49 }
 0x201   : > { %v3346_v3 = vpack.c.bf16 %v949_v62, %v948_v55  ;;  %v2842_v4 = vpop.f32.mrb[8].mxu1  ;;  %1766 = vmatprep.subr.bf16.mxu0 %v2703_v58  ;;  %1959 = vmatprep.subr.bf16.mxu1 %v2705_v59  ;;  %v2726_v55 = vcombine.low %v1034_v29, %v1038_v32  ;;  %v2735_v59 = vcombine.high %v1042_v44, %v1046_v47 }
 0x202   : > { %v858_v7 = vadd.f32 %v2842_v4, %v3326_v20  ;;  %v849_v8 = vpop.f32.mrb[9].mxu1 }
 0x203   : > { %1419 = vmatmul.mubr.bf16.gmra.mrb[36].mxu0 %v3332_v30  ;;  %1612 = vmatmul.mubr.bf16.gmra.mrb[36].mxu1 %v3332_v30  ;;  %v850_v12 = vadd.f32 %v3326_v20, %v849_v8  ;;  %v2843_v13 = vpop.f32.mrb[10].mxu1  ;;  %v2736_v8 = vcombine.low %v1043_v48, %v1047_v49 }
 0x204   : > { %v954_v17 = vmax.f32 %v858_v7, 0.0  ;;  %1428 = vmatprep.mubr.bf16.mxu0 %v3072_v57  ;;  %1621 = vmatprep.mubr.bf16.mxu1 %v3072_v57  ;;  %v861_v18 = vadd.f32 %v2843_v13, %v3326_v20  ;;  %v852_v19 = vpop.f32.mrb[11].mxu1  ;;  %v2734_v7 = vcombine.low %v1042_v44, %v1046_v47 }
 0x205   : > { %v952_v21 = vmax.f32 %v850_v12, 0.0  ;;  %v853_v22 = vadd.f32 %v3326_v20, %v852_v19  ;;  %1767 = vmatpush1.bf16.msra.mxu0 %v2702_v5  ;;  %1960 = vmatpush1.bf16.msra.mxu1 %v2704_v6  ;;  %v2745_v12 = vcombine.high %v1051_v0, %v1055_v1 }
 0x206   : > { %v955_v25 = vmax.f32 %v861_v18, 0.0  ;;  %1768 = vmatprep.subr.bf16.mxu0 %v2711_v9  ;;  %1961 = vmatprep.subr.bf16.mxu1 %v2713_v10 }
 0x207   : > { %v953_v31 = vmax.f32 %v853_v22, 0.0  ;;  %v2744_v22 = vcombine.low %v1051_v0, %v1055_v1 }
 0x208   : > { %v3356_v36 = vpack.c.bf16 %v955_v25, %v954_v17 }
 0x209   : > { %v3358_v37 = vpack.c.bf16 %v953_v31, %v952_v21  ;;  %v2846_v38 = vpop.f32.mrb[12].mxu1  ;;  %1769 = vmatpush1.bf16.msra.mxu0 %v2710_v23  ;;  %1962 = vmatpush1.bf16.msra.mxu1 %v2712_v24  ;;  %v2742_v21 = vcombine.low %v1050_v61, %v1054_v63 }
 0x20a   : > { %v874_v40 = vadd.f32 %v2846_v38, %v3326_v20  ;;  %v865_v41 = vpop.f32.mrb[13].mxu1  ;;  %1770 = vmatprep.subr.bf16.mxu0 %v2719_v26  ;;  %1963 = vmatprep.subr.bf16.mxu1 %v2721_v28 }
 0x20b   : > { %1429 = vmatmul.mubr.bf16.gmra.mrb[40].mxu0 %v3346_v3  ;;  %1622 = vmatmul.mubr.bf16.gmra.mrb[40].mxu1 %v3346_v3  ;;  %v866_v45 = vadd.f32 %v3326_v20, %v865_v41  ;;  %v2847_v46 = vpop.f32.mrb[14].mxu1 }
 0x20c   : > { %1438 = vmatprep.mubr.bf16.mxu0 %v3072_v57  ;;  %1631 = vmatprep.mubr.bf16.mxu1 %v3072_v57  ;;  %v958_v50 = vmax.f32 %v874_v40, 0.0  ;;  %v877_v51 = vadd.f32 %v2847_v46, %v3326_v20  ;;  %v868_v52 = vpop.f32.mrb[15].mxu1 }
 0x20d   : > { %v956_v53 = vmax.f32 %v866_v45, 0.0  ;;  %v869_v54 = vadd.f32 %v3326_v20, %v868_v52  ;;  %1771 = vmatpush1.bf16.msra.mxu0 %v2718_v27  ;;  %1964 = vmatpush1.bf16.msra.mxu1 %v2720_v39 }
 0x20e   : > { %v959_v58 = vmax.f32 %v877_v51, 0.0  ;;  %1772 = vmatprep.subr.bf16.mxu0 %v2727_v42  ;;  %1965 = vmatprep.subr.bf16.mxu1 %v2729_v43 }
 0x20f   : > { %v957_v62 = vmax.f32 %v869_v54, 0.0 }
 0x210   : > { %v3368_v4 = vpack.c.bf16 %v959_v58, %v958_v50 }
 0x211   : > { %v3370_v5 = vpack.c.bf16 %v957_v62, %v956_v53  ;;  %v2850_v6 = vpop.f32.mrb[16].mxu1  ;;  %1773 = vmatpush1.bf16.msra.mxu0 %v2726_v55  ;;  %1966 = vmatpush1.bf16.msra.mxu1 %v2728_v56 }
 0x212   : > { %v890_v9 = vadd.f32 %v2850_v6, %v3326_v20  ;;  %v881_v10 = vpop.f32.mrb[17].mxu1  ;;  %1774 = vmatprep.subr.bf16.mxu0 %v2735_v59  ;;  %1967 = vmatprep.subr.bf16.mxu1 %v2737_v60 }
 0x213   : > { %1439 = vmatmul.mubr.bf16.gmra.mrb[44].mxu0 %v3344_v2  ;;  %1632 = vmatmul.mubr.bf16.gmra.mrb[44].mxu1 %v3344_v2  ;;  %v882_v13 = vadd.f32 %v3326_v20, %v881_v10  ;;  %v2851_v14 = vpop.f32.mrb[18].mxu1 }
 0x214   : > { %1448 = vmatprep.mubr.bf16.mxu0 %v3072_v57  ;;  %1641 = vmatprep.mubr.bf16.mxu1 %v3072_v57  ;;  %v962_v15 = vmax.f32 %v890_v9, 0.0  ;;  %v893_v16 = vadd.f32 %v2851_v14, %v3326_v20  ;;  %v884_v17 = vpop.f32.mrb[19].mxu1 }
 0x215   : > { %v960_v18 = vmax.f32 %v882_v13, 0.0  ;;  %v885_v19 = vadd.f32 %v3326_v20, %v884_v17  ;;  %1775 = vmatpush1.bf16.msra.mxu0 %v2734_v7  ;;  %1968 = vmatpush1.bf16.msra.mxu1 %v2736_v8 }
 0x216   : > { %v963_v23 = vmax.f32 %v893_v16, 0.0  ;;  %1776 = vmatprep.subr.bf16.mxu0 %v2743_v11  ;;  %1969 = vmatprep.subr.bf16.mxu1 %v2745_v12 }
 0x217   : > { %v961_v24 = vmax.f32 %v885_v19, 0.0 }
 0x218   : > { %v3380_v25 = vpack.c.bf16 %v963_v23, %v962_v15 }
 0x219   : > { %v3382_v26 = vpack.c.bf16 %v961_v24, %v960_v18  ;;  %v2854_v28 = vpop.f32.mrb[20].mxu1  ;;  %1777 = vmatpush1.bf16.msra.mxu0 %v2742_v21  ;;  %1970 = vmatpush1.bf16.msra.mxu1 %v2744_v22 }
 0x21a   : > { %v906_v29 = vadd.f32 %v2854_v28, %v3326_v20  ;;  %v897_v31 = vpop.f32.mrb[21].mxu1 }
 0x21b   : > { %1449 = vmatmul.mubr.bf16.gmra.mrb[48].mxu0 %v3358_v37  ;;  %1642 = vmatmul.mubr.bf16.gmra.mrb[48].mxu1 %v3358_v37  ;;  %v898_v32 = vadd.f32 %v3326_v20, %v897_v31  ;;  %v2855_v34 = vpop.f32.mrb[22].mxu1 }
 0x21c   : > { %1458 = vmatprep.mubr.bf16.mxu0 %v3072_v57  ;;  %1651 = vmatprep.mubr.bf16.mxu1 %v3072_v57  ;;  %v966_v35 = vmax.f32 %v906_v29, 0.0  ;;  %v909_v38 = vadd.f32 %v2855_v34, %v3326_v20  ;;  %v900_v27 = vpop.f32.mrb[23].mxu1 }
 0x21d   : > { %v964_v39 = vmax.f32 %v898_v32, 0.0  ;;  %v901_v40 = vadd.f32 %v3326_v20, %v900_v27 }
 0x21e   : > { %v967_v41 = vmax.f32 %v909_v38, 0.0 }
 0x21f   : > { %v965_v42 = vmax.f32 %v901_v40, 0.0 }
 0x220   : > { %v3392_v43 = vpack.c.bf16 %v967_v41, %v966_v35 }
 0x221   : > { %v3394_v44 = vpack.c.bf16 %v965_v42, %v964_v39  ;;  %v2858_v45 = vpop.f32.mrb[24].mxu1 }
 0x222   : > { %v922_v46 = vadd.f32 %v2858_v45, %v3326_v20  ;;  %v913_v47 = vpop.f32.mrb[25].mxu1 }
 0x223   : > { %1459 = vmatmul.mubr.bf16.gmra.mrb[52].mxu0 %v3356_v36  ;;  %1652 = vmatmul.mubr.bf16.gmra.mrb[52].mxu1 %v3356_v36  ;;  %v914_v48 = vadd.f32 %v3326_v20, %v913_v47  ;;  %v2859_v49 = vpop.f32.mrb[26].mxu1 }
 0x224   : > { %1468 = vmatprep.mubr.bf16.mxu0 %v3072_v57  ;;  %1661 = vmatprep.mubr.bf16.mxu1 %v3072_v57  ;;  %v970_v50 = vmax.f32 %v922_v46, 0.0  ;;  %v925_v51 = vadd.f32 %v2859_v49, %v3326_v20  ;;  %v916_v52 = vpop.f32.mrb[27].mxu1 }
 0x225   : > { %v968_v53 = vmax.f32 %v914_v48, 0.0  ;;  %v917_v54 = vadd.f32 %v3326_v20, %v916_v52 }
 0x226   : > { %v971_v55 = vmax.f32 %v925_v51, 0.0 }
 0x227   : > { %v969_v56 = vmax.f32 %v917_v54, 0.0 }
 0x228   : > { %v3404_v58 = vpack.c.bf16 %v971_v55, %v970_v50 }
 0x229   : > { %v3406_v59 = vpack.c.bf16 %v969_v56, %v968_v53  ;;  %v2862_v60 = vpop.f32.mrb[28].mxu1 }
 0x22a   : > { %v938_v61 = vadd.f32 %v2862_v60, %v3326_v20  ;;  %v929_v62 = vpop.f32.mrb[29].mxu1 }
 0x22b   : > { %1469 = vmatmul.mubr.bf16.gmra.mrb[56].mxu0 %v3370_v5  ;;  %1662 = vmatmul.mubr.bf16.gmra.mrb[56].mxu1 %v3370_v5  ;;  %v930_v63 = vadd.f32 %v3326_v20, %v929_v62  ;;  %v2863_v0 = vpop.f32.mrb[30].mxu1 }
 0x22c   : > { %1478 = vmatprep.mubr.bf16.mxu0 %v3072_v57  ;;  %1671 = vmatprep.mubr.bf16.mxu1 %v3072_v57  ;;  %v974_v1 = vmax.f32 %v938_v61, 0.0  ;;  %v941_v6 = vadd.f32 %v2863_v0, %v3326_v20  ;;  %v932_v7 = vpop.f32.mrb[31].mxu1 }
 0x22d   : > { %v972_v8 = vmax.f32 %v930_v63, 0.0  ;;  %v933_v9 = vadd.f32 %v3326_v20, %v932_v7 }
 0x22e   : > { %v975_v10 = vmax.f32 %v941_v6, 0.0 }
 0x22f   : > { %v973_v11 = vmax.f32 %v933_v9, 0.0 }
 0x230   : > { %v3416_v12 = vpack.c.bf16 %v975_v10, %v974_v1 }
 0x231   : > { %v3418_v13 = vpack.c.bf16 %v973_v11, %v972_v8 }
 0x233   : > { %1479 = vmatmul.mubr.bf16.gmra.mrb[60].mxu0 %v3368_v4  ;;  %1672 = vmatmul.mubr.bf16.gmra.mrb[60].mxu1 %v3368_v4 }
 0x234   : > { %1488 = vmatprep.mubr.bf16.mxu0 %v3072_v57  ;;  %1681 = vmatprep.mubr.bf16.mxu1 %v3072_v57 }
 0x23b   : > { %1489 = vmatmul.mubr.bf16.gmra.mrb[64].mxu0 %v3382_v26  ;;  %1682 = vmatmul.mubr.bf16.gmra.mrb[64].mxu1 %v3382_v26 }
 0x23c   : > { %1498 = vmatprep.mubr.bf16.mxu0 %v3072_v57  ;;  %1691 = vmatprep.mubr.bf16.mxu1 %v3072_v57 }
 0x243   : > { %1499 = vmatmul.mubr.bf16.gmra.mrb[68].mxu0 %v3380_v25  ;;  %1692 = vmatmul.mubr.bf16.gmra.mrb[68].mxu1 %v3380_v25 }
 0x244   : > { %1508 = vmatprep.mubr.bf16.mxu0 %v3072_v57  ;;  %1701 = vmatprep.mubr.bf16.mxu1 %v3072_v57 }
 0x24b   : > { %1509 = vmatmul.mubr.bf16.gmra.mrb[72].mxu0 %v3394_v44  ;;  %1702 = vmatmul.mubr.bf16.gmra.mrb[72].mxu1 %v3394_v44 }
 0x24c   : > { %1518 = vmatprep.mubr.bf16.mxu0 %v3072_v57  ;;  %1711 = vmatprep.mubr.bf16.mxu1 %v3072_v57 }
 0x253   : > { %1519 = vmatmul.mubr.bf16.gmra.mrb[76].mxu0 %v3392_v43  ;;  %1712 = vmatmul.mubr.bf16.gmra.mrb[76].mxu1 %v3392_v43 }
 0x254   : > { %1528 = vmatprep.mubr.bf16.mxu0 %v3072_v57  ;;  %1721 = vmatprep.mubr.bf16.mxu1 %v3072_v57 }
 0x25b   : > { %1529 = vmatmul.mubr.bf16.gmra.mrb[80].mxu0 %v3406_v59  ;;  %1722 = vmatmul.mubr.bf16.gmra.mrb[80].mxu1 %v3406_v59 }
 0x25c   : > { %1538 = vmatprep.mubr.bf16.mxu0 %v3072_v57  ;;  %1731 = vmatprep.mubr.bf16.mxu1 %v3072_v57 }
 0x263   : > { %1539 = vmatmul.mubr.bf16.gmra.mrb[84].mxu0 %v3404_v58  ;;  %1732 = vmatmul.mubr.bf16.gmra.mrb[84].mxu1 %v3404_v58 }
 0x264   : > { %1548 = vmatprep.mubr.bf16.mxu0 %v3072_v57  ;;  %1741 = vmatprep.mubr.bf16.mxu1 %v3072_v57 }
 0x26b   : > { %1549 = vmatmul.mubr.bf16.gmra.mrb[88].mxu0 %v3418_v13  ;;  %1742 = vmatmul.mubr.bf16.gmra.mrb[88].mxu1 %v3418_v13 }
 0x26c   : > { %1558 = vmatprep.mubr.bf16.mxu0 %v3072_v57  ;;  %1751 = vmatprep.mubr.bf16.mxu1 %v3072_v57 }
 0x273   : > { %1559 = vmatmul.mubr.bf16.gmra.mrb[92].mxu0 %v3416_v12  ;;  %1752 = vmatmul.mubr.bf16.gmra.mrb[92].mxu1 %v3416_v12 }
 0x274   : > { %1794 = vmatprep.mubr.bf16.mxu0 %v3072_v57  ;;  %1987 = vmatprep.mubr.bf16.mxu1 %v3072_v57 }
 0x27b   : > { %1795 = vmatmul.mubr.bf16.vlgmr.msra.gmra.mrb[96].mxu0 %v3334_v33  ;;  %1988 = vmatmul.mubr.bf16.vlgmr.msra.gmra.mrb[96].mxu1 %v3334_v33 }
 0x27c   : > { %1804 = vmatprep.mubr.bf16.mxu0 %v3072_v57  ;;  %1997 = vmatprep.mubr.bf16.mxu1 %v3072_v57 }
 0x283   : > { %1805 = vmatmul.mubr.bf16.gmra.mrb[100].mxu0 %v3332_v30  ;;  %1998 = vmatmul.mubr.bf16.gmra.mrb[100].mxu1 %v3332_v30 }
 0x284   : > { %1814 = vmatprep.mubr.bf16.mxu0 %v3072_v57  ;;  %2007 = vmatprep.mubr.bf16.mxu1 %v3072_v57 }
 0x28b   : > { %1815 = vmatmul.mubr.bf16.gmra.mrb[104].mxu0 %v3346_v3  ;;  %2008 = vmatmul.mubr.bf16.gmra.mrb[104].mxu1 %v3346_v3 }
 0x28c   : > { %1824 = vmatprep.mubr.bf16.mxu0 %v3072_v57  ;;  %2017 = vmatprep.mubr.bf16.mxu1 %v3072_v57 }
 0x293   : > { %1825 = vmatmul.mubr.bf16.gmra.mrb[108].mxu0 %v3344_v2  ;;  %2018 = vmatmul.mubr.bf16.gmra.mrb[108].mxu1 %v3344_v2 }
 0x294   : > { %1834 = vmatprep.mubr.bf16.mxu0 %v3072_v57  ;;  %2027 = vmatprep.mubr.bf16.mxu1 %v3072_v57 }
 0x29b   : > { %1835 = vmatmul.mubr.bf16.gmra.mrb[112].mxu0 %v3358_v37  ;;  %2028 = vmatmul.mubr.bf16.gmra.mrb[112].mxu1 %v3358_v37 }
 0x29c   : > { %1844 = vmatprep.mubr.bf16.mxu0 %v3072_v57  ;;  %2037 = vmatprep.mubr.bf16.mxu1 %v3072_v57 }
 0x2a3   : > { %1845 = vmatmul.mubr.bf16.gmra.mrb[116].mxu0 %v3356_v36  ;;  %2038 = vmatmul.mubr.bf16.gmra.mrb[116].mxu1 %v3356_v36 }
 0x2a4   : > { %1854 = vmatprep.mubr.bf16.mxu0 %v3072_v57  ;;  %2047 = vmatprep.mubr.bf16.mxu1 %v3072_v57 }
 0x2ab   : > { %1855 = vmatmul.mubr.bf16.gmra.mrb[120].mxu0 %v3370_v5  ;;  %2048 = vmatmul.mubr.bf16.gmra.mrb[120].mxu1 %v3370_v5 }
 0x2ac   : > { %1864 = vmatprep.mubr.bf16.mxu0 %v3072_v57  ;;  %2057 = vmatprep.mubr.bf16.mxu1 %v3072_v57 }
 0x2b3   : > { %1865 = vmatmul.mubr.bf16.gmra.mrb[124].mxu0 %v3368_v4  ;;  %2058 = vmatmul.mubr.bf16.gmra.mrb[124].mxu1 %v3368_v4 }
 0x2b4   : > { %1874 = vmatprep.mubr.bf16.mxu0 %v3072_v57  ;;  %2067 = vmatprep.mubr.bf16.mxu1 %v3072_v57 }
 0x2bb   : > { %1875 = vmatmul.mubr.bf16.gmra.mrb[128].mxu0 %v3382_v26  ;;  %2068 = vmatmul.mubr.bf16.gmra.mrb[128].mxu1 %v3382_v26 }
 0x2bc   : > { %1884 = vmatprep.mubr.bf16.mxu0 %v3072_v57  ;;  %2077 = vmatprep.mubr.bf16.mxu1 %v3072_v57 }
 0x2c3   : > { %1885 = vmatmul.mubr.bf16.gmra.mrb[132].mxu0 %v3380_v25  ;;  %2078 = vmatmul.mubr.bf16.gmra.mrb[132].mxu1 %v3380_v25 }
 0x2c4   : > { %1894 = vmatprep.mubr.bf16.mxu0 %v3072_v57  ;;  %2087 = vmatprep.mubr.bf16.mxu1 %v3072_v57 }
 0x2cb   : > { %1895 = vmatmul.mubr.bf16.gmra.mrb[136].mxu0 %v3394_v44  ;;  %2088 = vmatmul.mubr.bf16.gmra.mrb[136].mxu1 %v3394_v44 }
 0x2cc   : > { %1904 = vmatprep.mubr.bf16.mxu0 %v3072_v57  ;;  %2097 = vmatprep.mubr.bf16.mxu1 %v3072_v57 }
 0x2ce   : > { %v1410_v20 = vpop.f32.mrb[32].mxu0  ;;  %v1603_v30 = vpop.f32.mrb[32].mxu1 }
 0x2cf   : > { %v1412_v33 = vpop.f32.mrb[33].mxu0  ;;  %v1605_v2 = vpop.f32.mrb[33].mxu1 }
 0x2d0   : > { %v1414_v3 = vpop.f32.mrb[34].mxu0  ;;  %v1607_v36 = vpop.f32.mrb[34].mxu1 }
 0x2d1   : > { %v2148_v37 = vmax.f32 %v1410_v20, %v1414_v3  ;;  %v2222_v4 = vmax.f32 %v1603_v30, %v1607_v36  ;;  %v1416_v5 = vpop.f32.mrb[35].mxu0  ;;  %v1609_v14 = vpop.f32.mrb[35].mxu1 }
 0x2d2   : > { %v2185_v15 = vmax.f32 %v1412_v33, %v1416_v5  ;;  %v2259_v16 = vmax.f32 %v1605_v2, %v1609_v14 }
 0x2d3   : > { %1905 = vmatmul.mubr.bf16.gmra.mrb[140].mxu0 %v3392_v43  ;;  %2098 = vmatmul.mubr.bf16.gmra.mrb[140].mxu1 %v3392_v43 }
 0x2d4   : > { %1914 = vmatprep.mubr.bf16.mxu0 %v3072_v57  ;;  %2107 = vmatprep.mubr.bf16.mxu1 %v3072_v57 }
 0x2d6   : > { %v1420_v17 = vpop.f32.mrb[36].mxu0  ;;  %v1613_v18 = vpop.f32.mrb[36].mxu1 }
 0x2d7   : > { %v2149_v19 = vmax.f32 %v2148_v37, %v1420_v17  ;;  %v2223_v21 = vmax.f32 %v2222_v4, %v1613_v18  ;;  %v1422_v22 = vpop.f32.mrb[37].mxu0  ;;  %v1615_v23 = vpop.f32.mrb[37].mxu1 }
 0x2d8   : > { %v2186_v24 = vmax.f32 %v2185_v15, %v1422_v22  ;;  %v2260_v25 = vmax.f32 %v2259_v16, %v1615_v23  ;;  %v1424_v26 = vpop.f32.mrb[38].mxu0  ;;  %v1617_v28 = vpop.f32.mrb[38].mxu1 }
 0x2d9   : > { %v2150_v29 = vmax.f32 %v2149_v19, %v1424_v26  ;;  %v2224_v31 = vmax.f32 %v2223_v21, %v1617_v28  ;;  %v1426_v32 = vpop.f32.mrb[39].mxu0  ;;  %v1619_v34 = vpop.f32.mrb[39].mxu1 }
 0x2da   : > { %v2187_v35 = vmax.f32 %v2186_v24, %v1426_v32  ;;  %v2261_v38 = vmax.f32 %v2260_v25, %v1619_v34 }
 0x2db   : > { %1915 = vmatmul.mubr.bf16.gmra.mrb[144].mxu0 %v3406_v59  ;;  %2108 = vmatmul.mubr.bf16.gmra.mrb[144].mxu1 %v3406_v59 }
 0x2dc   : > { %1924 = vmatprep.mubr.bf16.mxu0 %v3072_v57  ;;  %2117 = vmatprep.mubr.bf16.mxu1 %v3072_v57 }
 0x2de   : > { %v1430_v27 = vpop.f32.mrb[40].mxu0  ;;  %v1623_v39 = vpop.f32.mrb[40].mxu1 }
 0x2df   : > { %v2151_v40 = vmax.f32 %v2150_v29, %v1430_v27  ;;  %v2225_v41 = vmax.f32 %v2224_v31, %v1623_v39  ;;  %v1432_v42 = vpop.f32.mrb[41].mxu0  ;;  %v1625_v43 = vpop.f32.mrb[41].mxu1 }
 0x2e0   : > { %v2188_v44 = vmax.f32 %v2187_v35, %v1432_v42  ;;  %v2262_v45 = vmax.f32 %v2261_v38, %v1625_v43  ;;  %v1434_v46 = vpop.f32.mrb[42].mxu0  ;;  %v1627_v47 = vpop.f32.mrb[42].mxu1 }
 0x2e1   : > { %v2152_v48 = vmax.f32 %v2151_v40, %v1434_v46  ;;  %v2226_v49 = vmax.f32 %v2225_v41, %v1627_v47  ;;  %v1436_v50 = vpop.f32.mrb[43].mxu0  ;;  %v1629_v51 = vpop.f32.mrb[43].mxu1 }
 0x2e2   : > { %v2189_v52 = vmax.f32 %v2188_v44, %v1436_v50  ;;  %v2263_v53 = vmax.f32 %v2262_v45, %v1629_v51 }
 0x2e3   : > { %1925 = vmatmul.mubr.bf16.gmra.mrb[148].mxu0 %v3404_v58  ;;  %2118 = vmatmul.mubr.bf16.gmra.mrb[148].mxu1 %v3404_v58 }
 0x2e4   : > { %1934 = vmatprep.mubr.bf16.mxu0 %v3072_v57  ;;  %2127 = vmatprep.mubr.bf16.mxu1 %v3072_v57 }
 0x2e6   : > { %v1440_v54 = vpop.f32.mrb[44].mxu0  ;;  %v1633_v55 = vpop.f32.mrb[44].mxu1 }
 0x2e7   : > { %v2153_v56 = vmax.f32 %v2152_v48, %v1440_v54  ;;  %v2227_v59 = vmax.f32 %v2226_v49, %v1633_v55  ;;  %v1442_v60 = vpop.f32.mrb[45].mxu0  ;;  %v1635_v61 = vpop.f32.mrb[45].mxu1 }
 0x2e8   : > { %v2190_v62 = vmax.f32 %v2189_v52, %v1442_v60  ;;  %v2264_v63 = vmax.f32 %v2263_v53, %v1635_v61  ;;  %v1444_v0 = vpop.f32.mrb[46].mxu0  ;;  %v1637_v1 = vpop.f32.mrb[46].mxu1 }
 0x2e9   : > { %v2154_v6 = vmax.f32 %v2153_v56, %v1444_v0  ;;  %v2228_v7 = vmax.f32 %v2227_v59, %v1637_v1  ;;  %v1446_v8 = vpop.f32.mrb[47].mxu0  ;;  %v1639_v9 = vpop.f32.mrb[47].mxu1 }
 0x2ea   : > { %v2191_v10 = vmax.f32 %v2190_v62, %v1446_v8  ;;  %v2265_v58 = vmax.f32 %v2264_v63, %v1639_v9 }
 0x2eb   : > { %1935 = vmatmul.mubr.bf16.gmra.mrb[152].mxu0 %v3418_v13  ;;  %2128 = vmatmul.mubr.bf16.gmra.mrb[152].mxu1 %v3418_v13 }
 0x2ec   : > { %1944 = vmatprep.mubr.bf16.mxu0 %v3072_v57  ;;  %2137 = vmatprep.mubr.bf16.mxu1 %v3072_v57 }
 0x2ee   : > { %v1450_v11 = vpop.f32.mrb[48].mxu0  ;;  %v1643_v20 = vpop.f32.mrb[48].mxu1 }
 0x2ef   : > { %v2155_v30 = vmax.f32 %v2154_v6, %v1450_v11  ;;  %v2229_v33 = vmax.f32 %v2228_v7, %v1643_v20  ;;  %v1452_v2 = vpop.f32.mrb[49].mxu0  ;;  %v1645_v3 = vpop.f32.mrb[49].mxu1 }
 0x2f0   : > { %v2192_v36 = vmax.f32 %v2191_v10, %v1452_v2  ;;  %v2266_v37 = vmax.f32 %v2265_v58, %v1645_v3  ;;  %v1454_v4 = vpop.f32.mrb[50].mxu0  ;;  %v1647_v5 = vpop.f32.mrb[50].mxu1 }
 0x2f1   : > { %v2156_v14 = vmax.f32 %v2155_v30, %v1454_v4  ;;  %v2230_v15 = vmax.f32 %v2229_v33, %v1647_v5  ;;  %v1456_v16 = vpop.f32.mrb[51].mxu0  ;;  %v1649_v17 = vpop.f32.mrb[51].mxu1 }
 0x2f2   : > { %v2193_v18 = vmax.f32 %v2192_v36, %v1456_v16  ;;  %v2267_v13 = vmax.f32 %v2266_v37, %v1649_v17 }
 0x2f3   : > { %1945 = vmatmul.mubr.bf16.gmra.mrb[156].mxu0 %v3416_v12  ;;  %2138 = vmatmul.mubr.bf16.gmra.mrb[156].mxu1 %v3416_v12 }
 0x2f6   : > { %v1460_v57 = vpop.f32.mrb[52].mxu0  ;;  %v1653_v19 = vpop.f32.mrb[52].mxu1 }
 0x2f7   : > { %v2157_v21 = vmax.f32 %v2156_v14, %v1460_v57  ;;  %v2231_v22 = vmax.f32 %v2230_v15, %v1653_v19  ;;  %v1462_v23 = vpop.f32.mrb[53].mxu0  ;;  %v1655_v24 = vpop.f32.mrb[53].mxu1 }
 0x2f8   : > { %v2194_v25 = vmax.f32 %v2193_v18, %v1462_v23  ;;  %v2268_v26 = vmax.f32 %v2267_v13, %v1655_v24  ;;  %v1464_v28 = vpop.f32.mrb[54].mxu0  ;;  %v1657_v29 = vpop.f32.mrb[54].mxu1 }
 0x2f9   : > { %v2158_v31 = vmax.f32 %v2157_v21, %v1464_v28  ;;  %v2232_v32 = vmax.f32 %v2231_v22, %v1657_v29  ;;  %v1466_v34 = vpop.f32.mrb[55].mxu0  ;;  %v1659_v35 = vpop.f32.mrb[55].mxu1 }
 0x2fa   : > { %v2195_v38 = vmax.f32 %v2194_v25, %v1466_v34  ;;  %v2269_v27 = vmax.f32 %v2268_v26, %v1659_v35 }
 0x2fe   : > { %v1470_v39 = vpop.f32.mrb[56].mxu0  ;;  %v1663_v40 = vpop.f32.mrb[56].mxu1 }
 0x2ff   : > { %v2159_v41 = vmax.f32 %v2158_v31, %v1470_v39  ;;  %v2233_v12 = vmax.f32 %v2232_v32, %v1663_v40  ;;  %v1472_v42 = vpop.f32.mrb[57].mxu0  ;;  %v1665_v43 = vpop.f32.mrb[57].mxu1 }
 0x300   : > { %v2196_v44 = vmax.f32 %v2195_v38, %v1472_v42  ;;  %v2270_v45 = vmax.f32 %v2269_v27, %v1665_v43  ;;  %v1474_v46 = vpop.f32.mrb[58].mxu0  ;;  %v1667_v47 = vpop.f32.mrb[58].mxu1 }
 0x301   : > { %v2160_v48 = vmax.f32 %v2159_v41, %v1474_v46  ;;  %v2234_v49 = vmax.f32 %v2233_v12, %v1667_v47  ;;  %v1476_v50 = vpop.f32.mrb[59].mxu0  ;;  %v1669_v51 = vpop.f32.mrb[59].mxu1 }
 0x302   : > { %v2197_v52 = vmax.f32 %v2196_v44, %v1476_v50  ;;  %v2271_v53 = vmax.f32 %v2270_v45, %v1669_v51 }
 0x306   : > { %v1480_v54 = vpop.f32.mrb[60].mxu0  ;;  %v1673_v55 = vpop.f32.mrb[60].mxu1 }
 0x307   : > { %v2161_v56 = vmax.f32 %v2160_v48, %v1480_v54  ;;  %v2235_v59 = vmax.f32 %v2234_v49, %v1673_v55  ;;  %v1482_v60 = vpop.f32.mrb[61].mxu0  ;;  %v1675_v61 = vpop.f32.mrb[61].mxu1 }
 0x308   : > { %v2198_v62 = vmax.f32 %v2197_v52, %v1482_v60  ;;  %v2272_v63 = vmax.f32 %v2271_v53, %v1675_v61  ;;  %v1484_v0 = vpop.f32.mrb[62].mxu0  ;;  %v1677_v1 = vpop.f32.mrb[62].mxu1 }
 0x309   : > { %v2162_v6 = vmax.f32 %v2161_v56, %v1484_v0  ;;  %v2236_v7 = vmax.f32 %v2235_v59, %v1677_v1  ;;  %v1486_v8 = vpop.f32.mrb[63].mxu0  ;;  %v1679_v9 = vpop.f32.mrb[63].mxu1 }
 0x30a   : > { %v2199_v10 = vmax.f32 %v2198_v62, %v1486_v8  ;;  %v2273_v58 = vmax.f32 %v2272_v63, %v1679_v9 }
 0x30e   : > { %v1490_v11 = vpop.f32.mrb[64].mxu0  ;;  %v1683_v20 = vpop.f32.mrb[64].mxu1 }
 0x30f   : > { %v2163_v30 = vmax.f32 %v2162_v6, %v1490_v11  ;;  %v2237_v33 = vmax.f32 %v2236_v7, %v1683_v20  ;;  %v1492_v2 = vpop.f32.mrb[65].mxu0  ;;  %v1685_v3 = vpop.f32.mrb[65].mxu1 }
 0x310   : > { %v2200_v36 = vmax.f32 %v2199_v10, %v1492_v2  ;;  %v2274_v37 = vmax.f32 %v2273_v58, %v1685_v3  ;;  %v1494_v4 = vpop.f32.mrb[66].mxu0  ;;  %v1687_v5 = vpop.f32.mrb[66].mxu1 }
 0x311   : > { %v2164_v14 = vmax.f32 %v2163_v30, %v1494_v4  ;;  %v2238_v15 = vmax.f32 %v2237_v33, %v1687_v5  ;;  %v1496_v16 = vpop.f32.mrb[67].mxu0  ;;  %v1689_v17 = vpop.f32.mrb[67].mxu1 }
 0x312   : > { %v2201_v18 = vmax.f32 %v2200_v36, %v1496_v16  ;;  %v2275_v13 = vmax.f32 %v2274_v37, %v1689_v17 }
 0x316   : > { %v1500_v57 = vpop.f32.mrb[68].mxu0  ;;  %v1693_v19 = vpop.f32.mrb[68].mxu1 }
 0x317   : > { %v2165_v21 = vmax.f32 %v2164_v14, %v1500_v57  ;;  %v2239_v22 = vmax.f32 %v2238_v15, %v1693_v19  ;;  %v1502_v23 = vpop.f32.mrb[69].mxu0  ;;  %v1695_v24 = vpop.f32.mrb[69].mxu1 }
 0x318   : > { %v2202_v25 = vmax.f32 %v2201_v18, %v1502_v23  ;;  %v2276_v26 = vmax.f32 %v2275_v13, %v1695_v24  ;;  %v1504_v28 = vpop.f32.mrb[70].mxu0  ;;  %v1697_v29 = vpop.f32.mrb[70].mxu1 }
 0x319   : > { %v2166_v31 = vmax.f32 %v2165_v21, %v1504_v28  ;;  %v2240_v32 = vmax.f32 %v2239_v22, %v1697_v29  ;;  %v1506_v34 = vpop.f32.mrb[71].mxu0  ;;  %v1699_v35 = vpop.f32.mrb[71].mxu1 }
 0x31a   : > { %v2203_v38 = vmax.f32 %v2202_v25, %v1506_v34  ;;  %v2277_v27 = vmax.f32 %v2276_v26, %v1699_v35 }
 0x31e   : > { %v1510_v39 = vpop.f32.mrb[72].mxu0  ;;  %v1703_v40 = vpop.f32.mrb[72].mxu1 }
 0x31f   : > { %v2167_v41 = vmax.f32 %v2166_v31, %v1510_v39  ;;  %v2241_v12 = vmax.f32 %v2240_v32, %v1703_v40  ;;  %v1512_v42 = vpop.f32.mrb[73].mxu0  ;;  %v1705_v43 = vpop.f32.mrb[73].mxu1 }
 0x320   : > { %v2204_v44 = vmax.f32 %v2203_v38, %v1512_v42  ;;  %v2278_v45 = vmax.f32 %v2277_v27, %v1705_v43  ;;  %v1514_v46 = vpop.f32.mrb[74].mxu0  ;;  %v1707_v47 = vpop.f32.mrb[74].mxu1 }
 0x321   : > { %v2168_v48 = vmax.f32 %v2167_v41, %v1514_v46  ;;  %v2242_v49 = vmax.f32 %v2241_v12, %v1707_v47  ;;  %v1516_v50 = vpop.f32.mrb[75].mxu0  ;;  %v1709_v51 = vpop.f32.mrb[75].mxu1 }
 0x322   : > { %v2205_v52 = vmax.f32 %v2204_v44, %v1516_v50  ;;  %v2279_v53 = vmax.f32 %v2278_v45, %v1709_v51 }
 0x326   : > { %v1520_v54 = vpop.f32.mrb[76].mxu0  ;;  %v1713_v55 = vpop.f32.mrb[76].mxu1 }
 0x327   : > { %v2169_v56 = vmax.f32 %v2168_v48, %v1520_v54  ;;  %v2243_v59 = vmax.f32 %v2242_v49, %v1713_v55  ;;  %v1522_v60 = vpop.f32.mrb[77].mxu0  ;;  %v1715_v61 = vpop.f32.mrb[77].mxu1 }
 0x328   : > { %v2206_v62 = vmax.f32 %v2205_v52, %v1522_v60  ;;  %v2280_v63 = vmax.f32 %v2279_v53, %v1715_v61  ;;  %v1524_v0 = vpop.f32.mrb[78].mxu0  ;;  %v1717_v1 = vpop.f32.mrb[78].mxu1 }
 0x329   : > { %v2170_v6 = vmax.f32 %v2169_v56, %v1524_v0  ;;  %v2244_v7 = vmax.f32 %v2243_v59, %v1717_v1  ;;  %v1526_v8 = vpop.f32.mrb[79].mxu0  ;;  %v1719_v9 = vpop.f32.mrb[79].mxu1 }
 0x32a   : > { %v2207_v10 = vmax.f32 %v2206_v62, %v1526_v8  ;;  %v2281_v58 = vmax.f32 %v2280_v63, %v1719_v9 }
 0x32e   : > { %v1530_v11 = vpop.f32.mrb[80].mxu0  ;;  %v1723_v20 = vpop.f32.mrb[80].mxu1 }
 0x32f   : > { %v2171_v30 = vmax.f32 %v2170_v6, %v1530_v11  ;;  %v2245_v33 = vmax.f32 %v2244_v7, %v1723_v20  ;;  %v1532_v2 = vpop.f32.mrb[81].mxu0  ;;  %v1725_v3 = vpop.f32.mrb[81].mxu1 }
 0x330   : > { %v2208_v36 = vmax.f32 %v2207_v10, %v1532_v2  ;;  %v2282_v37 = vmax.f32 %v2281_v58, %v1725_v3  ;;  %v1534_v4 = vpop.f32.mrb[82].mxu0  ;;  %v1727_v5 = vpop.f32.mrb[82].mxu1  ;;  %v2465_v3 = vlaneseq }
 0x331   : > { %v2172_v14 = vmax.f32 %v2171_v30, %v1534_v4  ;;  %v2246_v15 = vmax.f32 %v2245_v33, %v1727_v5  ;;  %v1536_v16 = vpop.f32.mrb[83].mxu0  ;;  %v1729_v17 = vpop.f32.mrb[83].mxu1  ;;  %v3073_v33 = vmov 1966171168  }
 0x332   : > { %v2209_v18 = vmax.f32 %v2208_v36, %v1536_v16  ;;  %v2283_v13 = vmax.f32 %v2282_v37, %v1729_v17  ;;  %v2463_v2 = vunpack.c.l.s4 %v3073_v33 }
 0x336   : > { %v1540_v57 = vpop.f32.mrb[84].mxu0  ;;  %v1733_v19 = vpop.f32.mrb[84].mxu1 }
 0x337   : > { %v2173_v21 = vmax.f32 %v2172_v14, %v1540_v57  ;;  %v2247_v22 = vmax.f32 %v2246_v15, %v1733_v19  ;;  %v1542_v23 = vpop.f32.mrb[85].mxu0  ;;  %v1735_v24 = vpop.f32.mrb[85].mxu1 }
 0x338   : > { %v2210_v25 = vmax.f32 %v2209_v18, %v1542_v23  ;;  %v2284_v26 = vmax.f32 %v2283_v13, %v1735_v24  ;;  %v1544_v28 = vpop.f32.mrb[86].mxu0  ;;  %v1737_v29 = vpop.f32.mrb[86].mxu1 }
 0x339   : > { %v2174_v31 = vmax.f32 %v2173_v21, %v1544_v28  ;;  %v2248_v32 = vmax.f32 %v2247_v22, %v1737_v29  ;;  %v1546_v34 = vpop.f32.mrb[87].mxu0  ;;  %v1739_v35 = vpop.f32.mrb[87].mxu1  ;;  %v2464_v21 = vunpack.c.0.s8 %v2463_v2  ;;  %v2466_v22 = vshrl.u32 %v2465_v3, 7 }
 0x33a   : > { %v2211_v38 = vmax.f32 %v2210_v25, %v1546_v34  ;;  %v2285_v27 = vmax.f32 %v2284_v26, %v1739_v35 }
 0x33e   : > { %v1550_v39 = vpop.f32.mrb[88].mxu0  ;;  %v1743_v40 = vpop.f32.mrb[88].mxu1 }
 0x33f   : > { %v2175_v41 = vmax.f32 %v2174_v31, %v1550_v39  ;;  %v2249_v12 = vmax.f32 %v2248_v32, %v1743_v40  ;;  %v1552_v42 = vpop.f32.mrb[89].mxu0  ;;  %v1745_v43 = vpop.f32.mrb[89].mxu1 }
 0x340   : > { %v2212_v44 = vmax.f32 %v2211_v38, %v1552_v42  ;;  %v2286_v45 = vmax.f32 %v2285_v27, %v1745_v43  ;;  %v1554_v46 = vpop.f32.mrb[90].mxu0  ;;  %v1747_v47 = vpop.f32.mrb[90].mxu1 }
 0x341   : > { %v2176_v48 = vmax.f32 %v2175_v41, %v1554_v46  ;;  %v2250_v49 = vmax.f32 %v2249_v12, %v1747_v47  ;;  %v1556_v50 = vpop.f32.mrb[91].mxu0  ;;  %v1749_v51 = vpop.f32.mrb[91].mxu1  ;;  %v3518_v46 = vsub.s32 %v2464_v21, %v2466_v22 }
 0x342   : > { %v2213_v52 = vmax.f32 %v2212_v44, %v1556_v50  ;;  %v2287_v53 = vmax.f32 %v2286_v45, %v1749_v51 }
 0x346   : > { %v1560_v54 = vpop.f32.mrb[92].mxu0  ;;  %v1753_v55 = vpop.f32.mrb[92].mxu1 }
 0x347   : > { %v2177_v56 = vmax.f32 %v2176_v48, %v1560_v54  ;;  %v2251_v59 = vmax.f32 %v2250_v49, %v1753_v55  ;;  %v1562_v60 = vpop.f32.mrb[93].mxu0  ;;  %v1755_v61 = vpop.f32.mrb[93].mxu1 }
 0x348   : > { %v2214_v62 = vmax.f32 %v2213_v52, %v1562_v60  ;;  %v2288_v63 = vmax.f32 %v2287_v53, %v1755_v61  ;;  %v1564_v0 = vpop.f32.mrb[94].mxu0  ;;  %v1757_v1 = vpop.f32.mrb[94].mxu1 }
 0x349   : > { %v2178_v6 = vmax.f32 %v2177_v56, %v1564_v0  ;;  %v2252_v7 = vmax.f32 %v2251_v59, %v1757_v1  ;;  %v1566_v8 = vpop.f32.mrb[95].mxu0  ;;  %v1759_v9 = vpop.f32.mrb[95].mxu1 }
 0x34a   : > { %v2215_v10 = vmax.f32 %v2214_v62, %v1566_v8  ;;  %v2289_v58 = vmax.f32 %v2288_v63, %v1759_v9 }
 0x34b   : > { %v2179_v11 = vrot.slane %v2178_v6, 4  ;;  %v2253_v20 = vrot.slane %v2252_v7, 4 }
 0x34c   : > { %v2216_v30 = vrot.slane %v2215_v10, 4  ;;  %v2290_v36 = vrot.slane %v2289_v58, 4 }
 0x34d   : > { %v2180_v37 = vmax.f32 %v2178_v6, %v2179_v11  ;;  %v2254_v4 = vmax.f32 %v2252_v7, %v2253_v20 }
 0x34e   : > { %v2217_v5 = vmax.f32 %v2215_v10, %v2216_v30  ;;  %v2291_v14 = vmax.f32 %v2289_v58, %v2290_v36  ;;  %v1796_v15 = vpop.f32.mrb[96].mxu0  ;;  %v1989_v16 = vpop.f32.mrb[96].mxu1 }
 0x34f   : > { %v2181_v17 = vrot.slane %v2180_v37, 2  ;;  %v2255_v18 = vrot.slane %v2254_v4, 2  ;;  %v1798_v13 = vpop.f32.mrb[97].mxu0  ;;  %v1991_v57 = vpop.f32.mrb[97].mxu1 }
 0x350   : > { %v2218_v19 = vrot.slane %v2217_v5, 2  ;;  %v2292_v23 = vrot.slane %v2291_v14, 2  ;;  %v1800_v24 = vpop.f32.mrb[98].mxu0  ;;  %v1993_v25 = vpop.f32.mrb[98].mxu1 }
 0x351   : > { %v2182_v26 = vmax.f32 %v2180_v37, %v2181_v17  ;;  %v2256_v28 = vmax.f32 %v2254_v4, %v2255_v18  ;;  %v2296_v29 = vmax.f32 %v1796_v15, %v1800_v24  ;;  %v2370_v31 = vmax.f32 %v1989_v16, %v1993_v25  ;;  %v1802_v32 = vpop.f32.mrb[99].mxu0  ;;  %v1995_v34 = vpop.f32.mrb[99].mxu1 }
 0x352   : > { %v2219_v35 = vmax.f32 %v2217_v5, %v2218_v19  ;;  %v2293_v38 = vmax.f32 %v2291_v14, %v2292_v23  ;;  %v2333_v27 = vmax.f32 %v1798_v13, %v1802_v32  ;;  %v2407_v39 = vmax.f32 %v1991_v57, %v1995_v34 }
 0x353   : > { %v2183_v40 = vrot.slane %v2182_v26, 1  ;;  %v2257_v41 = vrot.slane %v2256_v28, 1 }
 0x354   : > { %v2220_v12 = vrot.slane %v2219_v35, 1  ;;  %v2294_v42 = vrot.slane %v2293_v38, 1 }
 0x355   : > { %v2184_v43 = vmax.f32 %v2182_v26, %v2183_v40  ;;  %v2258_v44 = vmax.f32 %v2256_v28, %v2257_v41 }
 0x356   : > { %v2221_v45 = vmax.f32 %v2219_v35, %v2220_v12  ;;  %v2295_v47 = vmax.f32 %v2293_v38, %v2294_v42  ;;  %v1806_v48 = vpop.f32.mrb[100].mxu0  ;;  %v1999_v49 = vpop.f32.mrb[100].mxu1 }
 0x357   : > { %v2297_v50 = vmax.f32 %v2296_v29, %v1806_v48  ;;  %v2371_v51 = vmax.f32 %v2370_v31, %v1999_v49  ;;  %v1808_v52 = vpop.f32.mrb[101].mxu0  ;;  %v2001_v53 = vpop.f32.mrb[101].mxu1 }
 0x358   : > { %v2458_v54 = vcombine.low %v2184_v43, %v2221_v45  ;;  %v2459_v55 = vcombine.low %v2258_v44, %v2295_v47  ;;  %v2334_v56 = vmax.f32 %v2333_v27, %v1808_v52  ;;  %v2408_v59 = vmax.f32 %v2407_v39, %v2001_v53  ;;  %v1810_v60 = vpop.f32.mrb[102].mxu0  ;;  %v2003_v61 = vpop.f32.mrb[102].mxu1 }
 0x359   : > { %v2298_v62 = vmax.f32 %v2297_v50, %v1810_v60  ;;  %v2372_v63 = vmax.f32 %v2371_v51, %v2003_v61  ;;  %v1812_v0 = vpop.f32.mrb[103].mxu0  ;;  %v2005_v1 = vpop.f32.mrb[103].mxu1 }
 0x35a   : > { %v3521_v6 = vrot.slane %v2458_v54, %v3518_v46  ;;  %v3524_v7 = vrot.slane %v2459_v55, %v3518_v46  ;;  %v2335_v8 = vmax.f32 %v2334_v56, %v1812_v0  ;;  %v2409_v9 = vmax.f32 %v2408_v59, %v2005_v1 }
 0x35c   : > { %v2490_v10 = vcombine.low %v3521_v6, %v3524_v7 }
 0x35e   : > { %v1816_v58 = vpop.f32.mrb[104].mxu0  ;;  %v2009_v11 = vpop.f32.mrb[104].mxu1 }
 0x35f   : > { %v2299_v20 = vmax.f32 %v2298_v62, %v1816_v58  ;;  %v2373_v30 = vmax.f32 %v2372_v63, %v2009_v11  ;;  %v1818_v33 = vpop.f32.mrb[105].mxu0  ;;  %v2011_v2 = vpop.f32.mrb[105].mxu1 }
 0x360   : > { %v2336_v3 = vmax.f32 %v2335_v8, %v1818_v33  ;;  %v2410_v36 = vmax.f32 %v2409_v9, %v2011_v2  ;;  %v1820_v37 = vpop.f32.mrb[106].mxu0  ;;  %v2013_v4 = vpop.f32.mrb[106].mxu1 }
 0x361   : > { %v2300_v5 = vmax.f32 %v2299_v20, %v1820_v37  ;;  %v2374_v14 = vmax.f32 %v2373_v30, %v2013_v4  ;;  %v1822_v15 = vpop.f32.mrb[107].mxu0  ;;  %v2015_v16 = vpop.f32.mrb[107].mxu1 }
 0x362   : > { %v2337_v17 = vmax.f32 %v2336_v3, %v1822_v15  ;;  %v2411_v18 = vmax.f32 %v2410_v36, %v2015_v16 }
 0x366   : > { %v1826_v13 = vpop.f32.mrb[108].mxu0  ;;  %v2019_v57 = vpop.f32.mrb[108].mxu1 }
 0x367   : > { %v2301_v19 = vmax.f32 %v2300_v5, %v1826_v13  ;;  %v2375_v21 = vmax.f32 %v2374_v14, %v2019_v57  ;;  %v1828_v22 = vpop.f32.mrb[109].mxu0  ;;  %v2021_v23 = vpop.f32.mrb[109].mxu1 }
 0x368   : > { %v2338_v24 = vmax.f32 %v2337_v17, %v1828_v22  ;;  %v2412_v25 = vmax.f32 %v2411_v18, %v2021_v23  ;;  %v1830_v26 = vpop.f32.mrb[110].mxu0  ;;  %v2023_v28 = vpop.f32.mrb[110].mxu1 }
 0x369   : > { %v2302_v29 = vmax.f32 %v2301_v19, %v1830_v26  ;;  %v2376_v31 = vmax.f32 %v2375_v21, %v2023_v28  ;;  %v1832_v32 = vpop.f32.mrb[111].mxu0  ;;  %v2025_v34 = vpop.f32.mrb[111].mxu1 }
 0x36a   : > { %v2339_v35 = vmax.f32 %v2338_v24, %v1832_v32  ;;  %v2413_v38 = vmax.f32 %v2412_v25, %v2025_v34 }
 0x36e   : > { %v1836_v27 = vpop.f32.mrb[112].mxu0  ;;  %v2029_v39 = vpop.f32.mrb[112].mxu1 }
 0x36f   : > { %v2303_v40 = vmax.f32 %v2302_v29, %v1836_v27  ;;  %v2377_v41 = vmax.f32 %v2376_v31, %v2029_v39  ;;  %v1838_v12 = vpop.f32.mrb[113].mxu0  ;;  %v2031_v42 = vpop.f32.mrb[113].mxu1 }
 0x370   : > { %v2340_v43 = vmax.f32 %v2339_v35, %v1838_v12  ;;  %v2414_v44 = vmax.f32 %v2413_v38, %v2031_v42  ;;  %v1840_v45 = vpop.f32.mrb[114].mxu0  ;;  %v2033_v47 = vpop.f32.mrb[114].mxu1 }
 0x371   : > { %v2304_v48 = vmax.f32 %v2303_v40, %v1840_v45  ;;  %v2378_v49 = vmax.f32 %v2377_v41, %v2033_v47  ;;  %v1842_v50 = vpop.f32.mrb[115].mxu0  ;;  %v2035_v51 = vpop.f32.mrb[115].mxu1 }
 0x372   : > { %v2341_v52 = vmax.f32 %v2340_v43, %v1842_v50  ;;  %v2415_v53 = vmax.f32 %v2414_v44, %v2035_v51 }
 0x376   : > { %v1846_v54 = vpop.f32.mrb[116].mxu0  ;;  %v2039_v55 = vpop.f32.mrb[116].mxu1 }
 0x377   : > { %v2305_v56 = vmax.f32 %v2304_v48, %v1846_v54  ;;  %v2379_v59 = vmax.f32 %v2378_v49, %v2039_v55  ;;  %v1848_v60 = vpop.f32.mrb[117].mxu0  ;;  %v2041_v61 = vpop.f32.mrb[117].mxu1 }
 0x378   : > { %v2342_v62 = vmax.f32 %v2341_v52, %v1848_v60  ;;  %v2416_v63 = vmax.f32 %v2415_v53, %v2041_v61  ;;  %v1850_v0 = vpop.f32.mrb[118].mxu0  ;;  %v2043_v1 = vpop.f32.mrb[118].mxu1 }
 0x379   : > { %v2306_v8 = vmax.f32 %v2305_v56, %v1850_v0  ;;  %v2380_v9 = vmax.f32 %v2379_v59, %v2043_v1  ;;  %v1852_v58 = vpop.f32.mrb[119].mxu0  ;;  %v2045_v11 = vpop.f32.mrb[119].mxu1 }
 0x37a   : > { %v2343_v20 = vmax.f32 %v2342_v62, %v1852_v58  ;;  %v2417_v30 = vmax.f32 %v2416_v63, %v2045_v11 }
 0x37e   : > { %v1856_v33 = vpop.f32.mrb[120].mxu0  ;;  %v2049_v2 = vpop.f32.mrb[120].mxu1 }
 0x37f   : > { %v2307_v3 = vmax.f32 %v2306_v8, %v1856_v33  ;;  %v2381_v36 = vmax.f32 %v2380_v9, %v2049_v2  ;;  %v1858_v37 = vpop.f32.mrb[121].mxu0  ;;  %v2051_v4 = vpop.f32.mrb[121].mxu1 }
 0x380   : > { %v2344_v5 = vmax.f32 %v2343_v20, %v1858_v37  ;;  %v2418_v14 = vmax.f32 %v2417_v30, %v2051_v4  ;;  %v1860_v15 = vpop.f32.mrb[122].mxu0  ;;  %v2053_v16 = vpop.f32.mrb[122].mxu1 }
 0x381   : > { %v2308_v17 = vmax.f32 %v2307_v3, %v1860_v15  ;;  %v2382_v18 = vmax.f32 %v2381_v36, %v2053_v16  ;;  %v1862_v13 = vpop.f32.mrb[123].mxu0  ;;  %v2055_v57 = vpop.f32.mrb[123].mxu1 }
 0x382   : > { %v2345_v19 = vmax.f32 %v2344_v5, %v1862_v13  ;;  %v2419_v21 = vmax.f32 %v2418_v14, %v2055_v57 }
 0x386   : > { %v1866_v22 = vpop.f32.mrb[124].mxu0  ;;  %v2059_v23 = vpop.f32.mrb[124].mxu1 }
 0x387   : > { %v2309_v24 = vmax.f32 %v2308_v17, %v1866_v22  ;;  %v2383_v25 = vmax.f32 %v2382_v18, %v2059_v23  ;;  %v1868_v26 = vpop.f32.mrb[125].mxu0  ;;  %v2061_v28 = vpop.f32.mrb[125].mxu1 }
 0x388   : > { %v2346_v29 = vmax.f32 %v2345_v19, %v1868_v26  ;;  %v2420_v31 = vmax.f32 %v2419_v21, %v2061_v28  ;;  %v1870_v32 = vpop.f32.mrb[126].mxu0  ;;  %v2063_v34 = vpop.f32.mrb[126].mxu1 }
 0x389   : > { %v2310_v35 = vmax.f32 %v2309_v24, %v1870_v32  ;;  %v2384_v38 = vmax.f32 %v2383_v25, %v2063_v34  ;;  %v1872_v27 = vpop.f32.mrb[127].mxu0  ;;  %v2065_v39 = vpop.f32.mrb[127].mxu1 }
 0x38a   : > { %v2347_v40 = vmax.f32 %v2346_v29, %v1872_v27  ;;  %v2421_v41 = vmax.f32 %v2420_v31, %v2065_v39 }
 0x38e   : > { %v1876_v12 = vpop.f32.mrb[128].mxu0  ;;  %v2069_v42 = vpop.f32.mrb[128].mxu1 }
 0x38f   : > { %v2311_v43 = vmax.f32 %v2310_v35, %v1876_v12  ;;  %v2385_v44 = vmax.f32 %v2384_v38, %v2069_v42  ;;  %v1878_v45 = vpop.f32.mrb[129].mxu0  ;;  %v2071_v47 = vpop.f32.mrb[129].mxu1 }
 0x390   : > { %v2348_v48 = vmax.f32 %v2347_v40, %v1878_v45  ;;  %v2422_v49 = vmax.f32 %v2421_v41, %v2071_v47  ;;  %v1880_v50 = vpop.f32.mrb[130].mxu0  ;;  %v2073_v51 = vpop.f32.mrb[130].mxu1 }
 0x391   : > { %v2312_v52 = vmax.f32 %v2311_v43, %v1880_v50  ;;  %v2386_v53 = vmax.f32 %v2385_v44, %v2073_v51  ;;  %v1882_v54 = vpop.f32.mrb[131].mxu0  ;;  %v2075_v55 = vpop.f32.mrb[131].mxu1 }
 0x392   : > { %v2349_v56 = vmax.f32 %v2348_v48, %v1882_v54  ;;  %v2423_v59 = vmax.f32 %v2422_v49, %v2075_v55 }
 0x396   : > { %v1886_v60 = vpop.f32.mrb[132].mxu0  ;;  %v2079_v61 = vpop.f32.mrb[132].mxu1 }
 0x397   : > { %v2313_v62 = vmax.f32 %v2312_v52, %v1886_v60  ;;  %v2387_v63 = vmax.f32 %v2386_v53, %v2079_v61  ;;  %v1888_v0 = vpop.f32.mrb[133].mxu0  ;;  %v2081_v1 = vpop.f32.mrb[133].mxu1 }
 0x398   : > { %v2350_v8 = vmax.f32 %v2349_v56, %v1888_v0  ;;  %v2424_v9 = vmax.f32 %v2423_v59, %v2081_v1  ;;  %v1890_v58 = vpop.f32.mrb[134].mxu0  ;;  %v2083_v11 = vpop.f32.mrb[134].mxu1 }
 0x399   : > { %v2314_v20 = vmax.f32 %v2313_v62, %v1890_v58  ;;  %v2388_v30 = vmax.f32 %v2387_v63, %v2083_v11  ;;  %v1892_v33 = vpop.f32.mrb[135].mxu0  ;;  %v2085_v2 = vpop.f32.mrb[135].mxu1 }
 0x39a   : > { %v2351_v3 = vmax.f32 %v2350_v8, %v1892_v33  ;;  %v2425_v36 = vmax.f32 %v2424_v9, %v2085_v2 }
 0x39e   : > { %v1896_v37 = vpop.f32.mrb[136].mxu0  ;;  %v2089_v4 = vpop.f32.mrb[136].mxu1 }
 0x39f   : > { %v2315_v5 = vmax.f32 %v2314_v20, %v1896_v37  ;;  %v2389_v14 = vmax.f32 %v2388_v30, %v2089_v4  ;;  %v1898_v15 = vpop.f32.mrb[137].mxu0  ;;  %v2091_v16 = vpop.f32.mrb[137].mxu1 }
 0x3a0   : > { %v2352_v17 = vmax.f32 %v2351_v3, %v1898_v15  ;;  %v2426_v18 = vmax.f32 %v2425_v36, %v2091_v16  ;;  %v1900_v13 = vpop.f32.mrb[138].mxu0  ;;  %v2093_v57 = vpop.f32.mrb[138].mxu1 }
 0x3a1   : > { %v2316_v19 = vmax.f32 %v2315_v5, %v1900_v13  ;;  %v2390_v21 = vmax.f32 %v2389_v14, %v2093_v57  ;;  %v1902_v22 = vpop.f32.mrb[139].mxu0  ;;  %v2095_v23 = vpop.f32.mrb[139].mxu1 }
 0x3a2   : > { %v2353_v24 = vmax.f32 %v2352_v17, %v1902_v22  ;;  %v2427_v25 = vmax.f32 %v2426_v18, %v2095_v23 }
 0x3a6   : > { %v1906_v26 = vpop.f32.mrb[140].mxu0  ;;  %v2099_v28 = vpop.f32.mrb[140].mxu1 }
 0x3a7   : > { %v2317_v29 = vmax.f32 %v2316_v19, %v1906_v26  ;;  %v2391_v31 = vmax.f32 %v2390_v21, %v2099_v28  ;;  %v1908_v32 = vpop.f32.mrb[141].mxu0  ;;  %v2101_v34 = vpop.f32.mrb[141].mxu1 }
 0x3a8   : > { %v2354_v35 = vmax.f32 %v2353_v24, %v1908_v32  ;;  %v2428_v38 = vmax.f32 %v2427_v25, %v2101_v34  ;;  %v1910_v27 = vpop.f32.mrb[142].mxu0  ;;  %v2103_v39 = vpop.f32.mrb[142].mxu1 }
 0x3a9   : > { %v2318_v40 = vmax.f32 %v2317_v29, %v1910_v27  ;;  %v2392_v41 = vmax.f32 %v2391_v31, %v2103_v39  ;;  %v1912_v12 = vpop.f32.mrb[143].mxu0  ;;  %v2105_v42 = vpop.f32.mrb[143].mxu1 }
 0x3aa   : > { %v2355_v43 = vmax.f32 %v2354_v35, %v1912_v12  ;;  %v2429_v44 = vmax.f32 %v2428_v38, %v2105_v42 }
 0x3ae   : > { %v1916_v45 = vpop.f32.mrb[144].mxu0  ;;  %v2109_v47 = vpop.f32.mrb[144].mxu1 }
 0x3af   : > { %v2319_v48 = vmax.f32 %v2318_v40, %v1916_v45  ;;  %v2393_v49 = vmax.f32 %v2392_v41, %v2109_v47  ;;  %v1918_v50 = vpop.f32.mrb[145].mxu0  ;;  %v2111_v51 = vpop.f32.mrb[145].mxu1 }
 0x3b0   : > { %v2356_v52 = vmax.f32 %v2355_v43, %v1918_v50  ;;  %v2430_v53 = vmax.f32 %v2429_v44, %v2111_v51  ;;  %v1920_v54 = vpop.f32.mrb[146].mxu0  ;;  %v2113_v55 = vpop.f32.mrb[146].mxu1 }
 0x3b1   : > { %v2320_v56 = vmax.f32 %v2319_v48, %v1920_v54  ;;  %v2394_v59 = vmax.f32 %v2393_v49, %v2113_v55  ;;  %v1922_v60 = vpop.f32.mrb[147].mxu0  ;;  %v2115_v61 = vpop.f32.mrb[147].mxu1 }
 0x3b2   : > { %v2357_v62 = vmax.f32 %v2356_v52, %v1922_v60  ;;  %v2431_v63 = vmax.f32 %v2430_v53, %v2115_v61 }
 0x3b6   : > { %v1926_v0 = vpop.f32.mrb[148].mxu0  ;;  %v2119_v1 = vpop.f32.mrb[148].mxu1 }
 0x3b7   : > { %v2321_v8 = vmax.f32 %v2320_v56, %v1926_v0  ;;  %v2395_v9 = vmax.f32 %v2394_v59, %v2119_v1  ;;  %v1928_v58 = vpop.f32.mrb[149].mxu0  ;;  %v2121_v11 = vpop.f32.mrb[149].mxu1 }
 0x3b8   : > { %v2358_v20 = vmax.f32 %v2357_v62, %v1928_v58  ;;  %v2432_v30 = vmax.f32 %v2431_v63, %v2121_v11  ;;  %v1930_v33 = vpop.f32.mrb[150].mxu0  ;;  %v2123_v2 = vpop.f32.mrb[150].mxu1 }
 0x3b9   : > { %v2322_v3 = vmax.f32 %v2321_v8, %v1930_v33  ;;  %v2396_v36 = vmax.f32 %v2395_v9, %v2123_v2  ;;  %v1932_v37 = vpop.f32.mrb[151].mxu0  ;;  %v2125_v4 = vpop.f32.mrb[151].mxu1 }
 0x3ba   : > { %v2359_v5 = vmax.f32 %v2358_v20, %v1932_v37  ;;  %v2433_v14 = vmax.f32 %v2432_v30, %v2125_v4 }
 0x3be   : > { %v1936_v15 = vpop.f32.mrb[152].mxu0  ;;  %v2129_v16 = vpop.f32.mrb[152].mxu1 }
 0x3bf   : > { %v2323_v17 = vmax.f32 %v2322_v3, %v1936_v15  ;;  %v2397_v18 = vmax.f32 %v2396_v36, %v2129_v16  ;;  %v1938_v13 = vpop.f32.mrb[153].mxu0  ;;  %v2131_v57 = vpop.f32.mrb[153].mxu1  ;;  %v2498_v16 = vrot.slane %v2490_v10, %v3518_v46 }
 0x3c0   : > { %v2360_v19 = vmax.f32 %v2359_v5, %v1938_v13  ;;  %v2434_v21 = vmax.f32 %v2433_v14, %v2131_v57  ;;  %v1940_v22 = vpop.f32.mrb[154].mxu0  ;;  %v2133_v23 = vpop.f32.mrb[154].mxu1 }
 0x3c1   : > { %v2324_v24 = vmax.f32 %v2323_v17, %v1940_v22  ;;  %v2398_v25 = vmax.f32 %v2397_v18, %v2133_v23  ;;  %v1942_v26 = vpop.f32.mrb[155].mxu0  ;;  %v2135_v28 = vpop.f32.mrb[155].mxu1 }
 0x3c2   : > { %v2361_v29 = vmax.f32 %v2360_v19, %v1942_v26  ;;  %v2435_v31 = vmax.f32 %v2434_v21, %v2135_v28 }
 0x3c6   : > { %v1946_v32 = vpop.f32.mrb[156].mxu0  ;;  %v2139_v34 = vpop.f32.mrb[156].mxu1 }
 0x3c7   : > { %v2325_v35 = vmax.f32 %v2324_v24, %v1946_v32  ;;  %v2399_v38 = vmax.f32 %v2398_v25, %v2139_v34  ;;  %v1948_v27 = vpop.f32.mrb[157].mxu0  ;;  %v2141_v39 = vpop.f32.mrb[157].mxu1 }
 0x3c8   : > { %v2362_v40 = vmax.f32 %v2361_v29, %v1948_v27  ;;  %v2436_v41 = vmax.f32 %v2435_v31, %v2141_v39  ;;  %v1950_v12 = vpop.f32.mrb[158].mxu0  ;;  %v2143_v42 = vpop.f32.mrb[158].mxu1 }
 0x3c9   : > { %v2326_v43 = vmax.f32 %v2325_v35, %v1950_v12  ;;  %v2400_v44 = vmax.f32 %v2399_v38, %v2143_v42  ;;  %v1952_v45 = vpop.f32.mrb[159].mxu0  ;;  %v2145_v47 = vpop.f32.mrb[159].mxu1 }
 0x3ca   : > { %v2363_v48 = vmax.f32 %v2362_v40, %v1952_v45  ;;  %v2437_v49 = vmax.f32 %v2436_v41, %v2145_v47 }
 0x3cb   : > { %v2327_v50 = vrot.slane %v2326_v43, 4  ;;  %v2401_v51 = vrot.slane %v2400_v44, 4 }
 0x3cc   : > { %v2364_v52 = vrot.slane %v2363_v48, 4  ;;  %v2438_v53 = vrot.slane %v2437_v49, 4 }
 0x3cd   : > { %v2328_v54 = vmax.f32 %v2326_v43, %v2327_v50  ;;  %v2402_v55 = vmax.f32 %v2400_v44, %v2401_v51 }
 0x3ce   : > { %v2365_v56 = vmax.f32 %v2363_v48, %v2364_v52  ;;  %v2439_v59 = vmax.f32 %v2437_v49, %v2438_v53 }
 0x3cf   : > { %v2329_v60 = vrot.slane %v2328_v54, 2  ;;  %v2403_v61 = vrot.slane %v2402_v55, 2 }
 0x3d0   : > { %v2366_v62 = vrot.slane %v2365_v56, 2  ;;  %v2440_v63 = vrot.slane %v2439_v59, 2 }
 0x3d1   : > { %v2330_v0 = vmax.f32 %v2328_v54, %v2329_v60  ;;  %v2404_v1 = vmax.f32 %v2402_v55, %v2403_v61 }
 0x3d2   : > { %v2367_v8 = vmax.f32 %v2365_v56, %v2366_v62  ;;  %v2441_v9 = vmax.f32 %v2439_v59, %v2440_v63 }
 0x3d3   : > { %v2331_v58 = vrot.slane %v2330_v0, 1  ;;  %v2405_v11 = vrot.slane %v2404_v1, 1 }
 0x3d4   : > { %v2368_v20 = vrot.slane %v2367_v8, 1  ;;  %v2442_v30 = vrot.slane %v2441_v9, 1 }
 0x3d5   : > { %v2332_v33 = vmax.f32 %v2330_v0, %v2331_v58  ;;  %v2406_v2 = vmax.f32 %v2404_v1, %v2405_v11 }
 0x3d6   : > { %v2369_v3 = vmax.f32 %v2367_v8, %v2368_v20  ;;  %v2443_v36 = vmax.f32 %v2441_v9, %v2442_v30 }
 0x3d8   : > { %v2460_v37 = vcombine.low %v2332_v33, %v2369_v3  ;;  %v2461_v4 = vcombine.low %v2406_v2, %v2443_v36 }
 0x3da   : > { %v2482_v5 = vrot.slane %v2460_v37, %v3518_v46  ;;  %v2489_v14 = vrot.slane %v2461_v4, %v3518_v46 }
 0x3dc   : > { %v2491_v15 = vcombine.low %v2482_v5, %v2489_v14 }
 0x3de   : > { %v2505_v17 = vrot.slane %v2491_v15, %v3518_v46 }
 0x3e0   : > { %v2506_v18 = vcombine.low %v2498_v16, %v2505_v17 }
 0x3e2   : > { %2509 = vst [vmem:[%s296_s28] sm:$0xff] %v2506_v18 }
 0x3e3   : > { %2997 = shalt.err (!%p2994_p6)
}
 0x3e4   : > { %s2998_s19 = scalar_lea.hbm %s3540_s16, 128  ;;  %s3002_s20 = scalar_lea.hbm %s3593_s6, 256 }
 0x3e5   : > { %p2999_p7 = scmp.ne.s32.totalorder %s3540_s16, %s2998_s19  ;;  %p3003_p0 = scmp.lt.u32.totalorder %s3540_s16, %s3593_s6 }
 0x3e6   : > { %p3004_p2 = scmp.lt.u32.totalorder %s3002_s20, %s2998_s19  ;;  %p3006_p8 = scmp.lt.u32.totalorder %s2998_s19, %s3540_s16 }
 0x3e7   : > { %p3000_p9 = pnand %p2999_p7, %p3605_p10 }
 0x3e8   : > { %p3005_p4 = por %p3004_p2, %p3003_p0 }
 0x3e9   : > { %p3001_p12 = pneg %p3000_p9 }
 0x3ea   : > { %p3007_p11 = por %p3006_p8, %p3005_p4 }
 0x3ec   : > { %p3008_p13 = pnand %p3007_p11, %p3001_p12 }
 0x3ee   : > { %3011 = shalt.err (!%p3008_p13)
}
 0x3ef   : > { %2868 = dma.vmem_to_hbm [thread:$0]  (%p3605_p10), %s3542_s30, 128, %s3540_s16, %s2511_s17  }
 0x3f0 PF: > { %p2880_p1 = scmp.ge.s32.totalorder %s3066_s26, 2  ;;  %s2539_s8 = sand.u32 1, %s3046_s21  }
 0x3f1   : > { %p3606_p3 = scmp.ne.s32.totalorder %s3599_s9, 0  ;;  %s2540_s13 = scalar_lea.sflag [#allocation4], %s2539_s8 }
 0x3f3   : > { %p2875_p5 = pnand %p2880_p1, %p3606_p3 }
 0x3f5   : > { %3041 = dma.done.wait (!%p2875_p5), %s2540_s13, 128  }
 0x3f6   : > { %3043 = vsyncadd (!%p2875_p5), %s2540_s13, 4294967168  ;;  %s20_s26 = sadd.s32 1, %s3066_s26   ;;  %s3607_s21 = smov %s3050_s22 }
 0x3f7   : > { %p17_p6 = scmp.ge.s32.totalorder %s20_s26, 4   ;;  %s3608_s22 = smov %s3054_s23 }
 0x3f8   : > { %s3609_s23 = smov %s3163_s10  ;;  %s3610_s24 = smov %s3062_s25 }
 0x3f9   : > { %s3611_s25 = smov %s3613_s29  ;;  %19 = sbr.rel (!%p17_p6) target bundleno = 5 (0x5), region = 88 }
 0x400   :  { %2545 = vsyncpa [#allocation3], 1 }
 0x401   :  { %2547 = vsyncpa [#allocation3 + $0x1], 1 }
 0x402   :  { %2548 = vsyncpa [#allocation4], 1 }
 0x403   :  { %2550 = vsyncpa [#allocation4 + $0x1], 1 }

</bundles_post_ra>
